<compile_context>
chip_gen: v6e
topology: v6e:2x2x1
jax: 0.10.0
libtpu: 0.0.40
codegen_flags: <defaults>
</compile_context>

<pallas_src>
import jax
import jax.numpy as jnp
from jax.experimental import pallas as pl
from jax.experimental.pallas import tpu as pltpu


# ---------------------------------------------------------------------------
# Kernels
# ---------------------------------------------------------------------------

def _layer(h, w, b, scale=None):
    """bf16 x bf16 -> fp32-accumulated dot, optional per-channel rescale, bias."""
    y = jnp.dot(h, w, preferred_element_type=jnp.float32)
    if scale is not None:
        y = y * scale          # per-output-channel dequant scale (fp32)
    return y + b


def _relu_bf16(y):
    return jnp.maximum(y, 0.0).astype(jnp.bfloat16)


def hopper_kernel_int8(x_ref,
                       w1_ref, b1_ref,
                       w2_ref, s2_ref, b2_ref,
                       w3_ref, s3_ref, b3_ref,
                       w4_ref, s4_ref, b4_ref,
                       wh_ref, bh_ref,
                       head_ref):
    """Small-batch path: w2/w3/w4 arrive as int8; VPU-dequant to bf16 per dot."""
    h = x_ref[...].astype(jnp.bfloat16)
    h = _relu_bf16(_layer(h, w1_ref[...], b1_ref[...]))
    h = _relu_bf16(_layer(h, w2_ref[...].astype(jnp.bfloat16), b2_ref[...], s2_ref[...]))
    h = _relu_bf16(_layer(h, w3_ref[...].astype(jnp.bfloat16), b3_ref[...], s3_ref[...]))
    h = _relu_bf16(_layer(h, w4_ref[...].astype(jnp.bfloat16), b4_ref[...], s4_ref[...]))
    # Fused head: cols 0..2 = pi_loc (mu), col 3 = value.
    head_ref[...] = _layer(h, wh_ref[...], bh_ref[...])


def hopper_kernel_bf16(x_ref,
                       w1_ref, b1_ref,
                       w2_ref, b2_ref,
                       w3_ref, b3_ref,
                       w4_ref, b4_ref,
                       wh_ref, bh_ref,
                       head_ref):
    """Large-batch path: all weights already bf16 (dequantized once in wrapper)."""
    h = x_ref[...].astype(jnp.bfloat16)
    h = _relu_bf16(_layer(h, w1_ref[...], b1_ref[...]))
    h = _relu_bf16(_layer(h, w2_ref[...], b2_ref[...]))
    h = _relu_bf16(_layer(h, w3_ref[...], b3_ref[...]))
    h = _relu_bf16(_layer(h, w4_ref[...], b4_ref[...]))
    head_ref[...] = _layer(h, wh_ref[...], bh_ref[...])


# ---------------------------------------------------------------------------
# Wrappers
# ---------------------------------------------------------------------------

_SMALL_B_MAX = 1024   # single-block, int8-streamed path up to this batch size
_TB_MAX = 512         # batch tile for the large path (v7x-VMEM-safe)


def _forward_small(obs, params):
    """B <= _SMALL_B_MAX: single grid step, int8 weights (halved DMA stream)."""
    B = obs.shape[0]

    def full(shape):
        # Full-array block (exempt from the (8,128) divisibility rule).
        return pl.BlockSpec(shape, lambda i, _s=shape: (0,) * len(_s))

    in_specs = [
        full((B, 11)),
        full((11, 1024)),  full((1, 1024)),
        full((1024, 512)), full((1, 512)), full((1, 512)),   # w2q, s2, b2
        full((512, 256)),  full((1, 256)), full((1, 256)),   # w3q, s3, b3
        full((256, 512)),  full((1, 512)), full((1, 512)),   # w4q, s4, b4
        full((512, 4)),    full((1, 4)),                      # wh, bh
    ]
    out_specs = full((B, 4))

    return pl.pallas_call(
        hopper_kernel_int8,
        out_shape=jax.ShapeDtypeStruct((B, 4), jnp.float32),
        grid=(1,),
        in_specs=in_specs,
        out_specs=out_specs,
        compiler_params=pltpu.CompilerParams(
            dimension_semantics=("arbitrary",),   # single TC: no duplicated weight stream on v7x
            vmem_limit_bytes=32 << 20,
        ),
    )(obs,
      params["w1"], params["b1"],
      params["w2q"], params["s2"], params["b2"],
      params["w3q"], params["s3"], params["b3"],
      params["w4q"], params["s4"], params["b4"],
      params["wh"], params["bh"])


def _forward_large(obs, params):
    """B > _SMALL_B_MAX: tiled batch, bf16 weights, lane-dense (128-col) head."""
    B = obs.shape[0]

    # Adaptive tile: minimize padding waste, keep TB a multiple of 8, TB <= 512.
    num_tiles = (B + _TB_MAX - 1) // _TB_MAX
    TB = -(-B // num_tiles)            # ceil(B / num_tiles)
    TB = ((TB + 7) // 8) * 8           # sublane multiple
    B_pad = num_tiles * TB
    obs_p = jnp.pad(obs, ((0, B_pad - B), (0, 0))) if B_pad != B else obs

    # Dequantize once in the wrapper (negligible vs. compute at large B);
    # kernel stays pure bf16 -> no per-grid-step VPU dequant.
    w2 = (params["w2q"].astype(jnp.float32) * params["s2"]).astype(jnp.bfloat16)
    w3 = (params["w3q"].astype(jnp.float32) * params["s3"]).astype(jnp.bfloat16)
    w4 = (params["w4q"].astype(jnp.float32) * params["s4"]).astype(jnp.bfloat16)

    # Lane-dense head output: pad to 128 columns (cols 0..2 mu, col 3 value,
    # rest zero) so the output store is an unmasked vst.
    HEAD = 128
    wh = jnp.pad(params["wh"], ((0, 0), (0, HEAD - 4)))
    bh = jnp.pad(params["bh"], ((0, 0), (0, HEAD - 4)))

    def resident(shape):
        # Constant block index across the batch grid -> weight block is not
        # re-DMA'd between grid steps.
        return pl.BlockSpec(shape, lambda i, _s=shape: (0,) * len(_s))

    in_specs = [
        pl.BlockSpec((TB, 11), lambda i: (i, 0)),     # obs tile
        resident((11, 1024)),  resident((1, 1024)),
        resident((1024, 512)), resident((1, 512)),
        resident((512, 256)),  resident((1, 256)),
        resident((256, 512)),  resident((1, 512)),
        resident((512, HEAD)), resident((1, HEAD)),
    ]
    out_specs = pl.BlockSpec((TB, HEAD), lambda i: (i, 0))

    # "parallel" shards the batch across v7x's 2 TCs but duplicates the weight
    # stream per TC; only worth it once there is enough compute per TC.
    semantics = ("parallel",) if B >= 2048 else ("arbitrary",)

    return pl.pallas_call(
        hopper_kernel_bf16,
        out_shape=jax.ShapeDtypeStruct((B_pad, HEAD), jnp.float32),
        grid=(num_tiles,),
        in_specs=in_specs,
        out_specs=out_specs,
        compiler_params=pltpu.CompilerParams(
            dimension_semantics=semantics,
            vmem_limit_bytes=32 << 20,
        ),
    )(obs_p,
      params["w1"], params["b1"],
      w2, params["b2"],
      w3, params["b3"],
      w4, params["b4"],
      wh, bh)


def nn_hopper_forward(obs, params):
    """Returns ((mu, sigma), value) — Normal(mu, sigma) params and the value."""
    B = obs.shape[0]
    if B <= _SMALL_B_MAX:
        head = _forward_small(obs, params)
    else:
        head = _forward_large(obs, params)

    mu = head[:B, :3]
    value = head[:B, 3]
    # sigma = exp(pi_scale) is batch-invariant: computed outside the kernel.
    sigma = jnp.broadcast_to(jnp.exp(params["log_sigma"])[None, :], (B, 3))
    # TODO(synk): torch.distributions.Normal has no Pallas equivalent; return its params.
    return (mu, sigma), value


# ---------------------------------------------------------------------------
# Parameters
# ---------------------------------------------------------------------------

def _linear_params(key, fan_in, fan_out):
    """Deterministic init mimicking PyTorch nn.Linear default (uniform +-1/sqrt(fan_in))."""
    kw, kb = jax.random.split(key)
    bound = 1.0 / jnp.sqrt(jnp.float32(fan_in))
    w = jax.random.uniform(kw, (fan_in, fan_out), jnp.float32, -bound, bound)
    b = jax.random.uniform(kb, (1, fan_out), jnp.float32, -bound, bound)
    return w, b


def _quantize_int8(w):
    """Per-output-channel symmetric int8 quantization. Returns (int8 weights, fp32 scales)."""
    amax = jnp.max(jnp.abs(w), axis=0, keepdims=True)          # (1, N)
    scale = jnp.maximum(amax, 1e-8) / 127.0
    wq = jnp.clip(jnp.round(w / scale), -127.0, 127.0).astype(jnp.int8)
    return wq, scale.astype(jnp.float32)


def init_params(key):
    keys = jax.random.split(key, 6)
    w1, b1 = _linear_params(keys[0], 11, 1024)
    w2, b2 = _linear_params(keys[1], 1024, 512)
    w3, b3 = _linear_params(keys[2], 512, 256)
    w4, b4 = _linear_params(keys[3], 256, 512)
    wp, bp = _linear_params(keys[4], 512, 3)
    wv, bv = _linear_params(keys[5], 512, 1)

    # Fused pi_loc + value head (cols 0..2 = mu, col 3 = value); tiny -> bf16.
    wh = jnp.concatenate([wp, wv], axis=1)   # (512, 4)
    bh = jnp.concatenate([bp, bv], axis=1)   # (1, 4)

    # The three large layers are stored int8 + per-channel fp32 scale
    # (halves the dominant weight HBM->VMEM stream at small batch).
    w2q, s2 = _quantize_int8(w2)
    w3q, s3 = _quantize_int8(w3)
    w4q, s4 = _quantize_int8(w4)

    return {
        "w1": w1.astype(jnp.bfloat16), "b1": b1,          # 22 KB: not worth quantizing
        "w2q": w2q, "s2": s2, "b2": b2,
        "w3q": w3q, "s3": s3, "b3": b3,
        "w4q": w4q, "s4": s4, "b4": b4,
        "wh": wh.astype(jnp.bfloat16), "bh": bh,
        "log_sigma": jnp.zeros((3,), jnp.float32),        # nn.Parameter(torch.zeros(3))
    }


# ---------------------------------------------------------------------------
# Smoke test
# ---------------------------------------------------------------------------

if __name__ == "__main__":
    key = jax.random.PRNGKey(0)
    k_obs, k_params = jax.random.split(key)

    B = 8  # small batch of Hopper-v5 observations (obs_dim = 11)
    obs = jax.random.normal(k_obs, (B, 11), jnp.float32)
    params = init_params(k_params)

    (mu, sigma), value = jax.jit(nn_hopper_forward)(obs, params)
    jax.block_until_ready((mu, sigma, value))

    assert mu.shape == (B, 3)
    assert sigma.shape == (B, 3)
    assert value.shape == (B,)
    assert bool(jnp.all(jnp.isfinite(mu))) and bool(jnp.all(jnp.isfinite(value)))
    print("KERNEL_OK")
</pallas_src>

<mosaic_0001>
module attributes {stable_mosaic.version = 11 : i64} {
  func.func @hopper_kernel_int8(%arg0: i32, %arg1: memref<8x11xf32, #tpu.memory_space<vmem>>, %arg2: memref<11x1024xbf16, #tpu.memory_space<vmem>>, %arg3: memref<1x1024xf32, #tpu.memory_space<vmem>>, %arg4: memref<1024x512xi8, #tpu.memory_space<vmem>>, %arg5: memref<1x512xf32, #tpu.memory_space<vmem>>, %arg6: memref<1x512xf32, #tpu.memory_space<vmem>>, %arg7: memref<512x256xi8, #tpu.memory_space<vmem>>, %arg8: memref<1x256xf32, #tpu.memory_space<vmem>>, %arg9: memref<1x256xf32, #tpu.memory_space<vmem>>, %arg10: memref<256x512xi8, #tpu.memory_space<vmem>>, %arg11: memref<1x512xf32, #tpu.memory_space<vmem>>, %arg12: memref<1x512xf32, #tpu.memory_space<vmem>>, %arg13: memref<512x4xbf16, #tpu.memory_space<vmem>>, %arg14: memref<1x4xf32, #tpu.memory_space<vmem>>, %arg15: memref<8x4xf32, #tpu.memory_space<vmem>>) attributes {dimension_semantics = [#tpu.dimension_semantics<arbitrary>], iteration_bounds = array<i64: 1>, scalar_prefetch = 0 : i64, scratch_operands = 0 : i64, tpu.core_type = #tpu.core_type<tc>, window_params = [{pipeline_mode = #tpu.pipeline_mode<synchronous>, transform_indices = @transform_0, window_bounds = array<i64: 8, 11>}, {pipeline_mode = #tpu.pipeline_mode<synchronous>, transform_indices = @transform_1, window_bounds = array<i64: 11, 1024>}, {pipeline_mode = #tpu.pipeline_mode<synchronous>, transform_indices = @transform_2, window_bounds = array<i64: 1, 1024>}, {pipeline_mode = #tpu.pipeline_mode<synchronous>, transform_indices = @transform_3, window_bounds = array<i64: 1024, 512>}, {pipeline_mode = #tpu.pipeline_mode<synchronous>, transform_indices = @transform_4, window_bounds = array<i64: 1, 512>}, {pipeline_mode = #tpu.pipeline_mode<synchronous>, transform_indices = @transform_5, window_bounds = array<i64: 1, 512>}, {pipeline_mode = #tpu.pipeline_mode<synchronous>, transform_indices = @transform_6, window_bounds = array<i64: 512, 256>}, {pipeline_mode = #tpu.pipeline_mode<synchronous>, transform_indices = @transform_7, window_bounds = array<i64: 1, 256>}, {pipeline_mode = #tpu.pipeline_mode<synchronous>, transform_indices = @transform_8, window_bounds = array<i64: 1, 256>}, {pipeline_mode = #tpu.pipeline_mode<synchronous>, transform_indices = @transform_9, window_bounds = array<i64: 256, 512>}, {pipeline_mode = #tpu.pipeline_mode<synchronous>, transform_indices = @transform_10, window_bounds = array<i64: 1, 512>}, {pipeline_mode = #tpu.pipeline_mode<synchronous>, transform_indices = @transform_11, window_bounds = array<i64: 1, 512>}, {pipeline_mode = #tpu.pipeline_mode<synchronous>, transform_indices = @transform_12, window_bounds = array<i64: 512, 4>}, {pipeline_mode = #tpu.pipeline_mode<synchronous>, transform_indices = @transform_13, window_bounds = array<i64: 1, 4>}, {pipeline_mode = #tpu.pipeline_mode<synchronous>, transform_indices = @transform_14, window_bounds = array<i64: 8, 4>}]} {
    %c0 = arith.constant 0 : index
    %c0_0 = arith.constant 0 : index
    %0 = vector.load %arg1[%c0, %c0_0] : memref<8x11xf32, #tpu.memory_space<vmem>>, vector<8x11xf32>
    %1 = arith.truncf %0 : vector<8x11xf32> to vector<8x11xbf16>
    %c0_1 = arith.constant 0 : index
    %c0_2 = arith.constant 0 : index
    %2 = vector.load %arg2[%c0_1, %c0_2] : memref<11x1024xbf16, #tpu.memory_space<vmem>>, vector<11x1024xbf16>
    %c0_3 = arith.constant 0 : index
    %c0_4 = arith.constant 0 : index
    %3 = vector.load %arg3[%c0_3, %c0_4] : memref<1x1024xf32, #tpu.memory_space<vmem>>, vector<1x1024xf32>
    %cst = arith.constant dense<0.000000e+00> : vector<8x1024xf32>
    %4 = tpu.matmul %1, %2, %cst {dimension_numbers = #tpu.dot_dimension_numbers<[1], [0], [0], [1], [0, 0, 1, 1], [], []>} : vector<8x11xbf16>, vector<11x1024xbf16>, vector<8x1024xf32> -> vector<8x1024xf32>
    %5 = vector.broadcast %3 : vector<1x1024xf32> to vector<8x1024xf32>
    %6 = arith.addf %4, %5 : vector<8x1024xf32>
    %cst_5 = arith.constant 0.000000e+00 : f32
    %7 = vector.broadcast %cst_5 : f32 to vector<8x1024xf32>
    %8 = arith.maximumf %6, %7 : vector<8x1024xf32>
    %9 = arith.truncf %8 : vector<8x1024xf32> to vector<8x1024xbf16>
    %c0_6 = arith.constant 0 : index
    %c0_7 = arith.constant 0 : index
    %10 = vector.load %arg4[%c0_6, %c0_7] : memref<1024x512xi8, #tpu.memory_space<vmem>>, vector<1024x512xi8>
    %11 = arith.sitofp %10 : vector<1024x512xi8> to vector<1024x512xbf16>
    %c0_8 = arith.constant 0 : index
    %c0_9 = arith.constant 0 : index
    %12 = vector.load %arg6[%c0_8, %c0_9] : memref<1x512xf32, #tpu.memory_space<vmem>>, vector<1x512xf32>
    %c0_10 = arith.constant 0 : index
    %c0_11 = arith.constant 0 : index
    %13 = vector.load %arg5[%c0_10, %c0_11] : memref<1x512xf32, #tpu.memory_space<vmem>>, vector<1x512xf32>
    %cst_12 = arith.constant dense<0.000000e+00> : vector<8x512xf32>
    %14 = tpu.matmul %9, %11, %cst_12 {dimension_numbers = #tpu.dot_dimension_numbers<[1], [0], [0], [1], [0, 0, 1, 1], [], []>} : vector<8x1024xbf16>, vector<1024x512xbf16>, vector<8x512xf32> -> vector<8x512xf32>
    %15 = vector.broadcast %13 : vector<1x512xf32> to vector<8x512xf32>
    %16 = arith.mulf %14, %15 : vector<8x512xf32>
    %17 = vector.broadcast %12 : vector<1x512xf32> to vector<8x512xf32>
    %18 = arith.addf %16, %17 : vector<8x512xf32>
    %cst_13 = arith.constant 0.000000e+00 : f32
    %19 = vector.broadcast %cst_13 : f32 to vector<8x512xf32>
    %20 = arith.maximumf %18, %19 : vector<8x512xf32>
    %21 = arith.truncf %20 : vector<8x512xf32> to vector<8x512xbf16>
    %c0_14 = arith.constant 0 : index
    %c0_15 = arith.constant 0 : index
    %22 = vector.load %arg7[%c0_14, %c0_15] : memref<512x256xi8, #tpu.memory_space<vmem>>, vector<512x256xi8>
    %23 = arith.sitofp %22 : vector<512x256xi8> to vector<512x256xbf16>
    %c0_16 = arith.constant 0 : index
    %c0_17 = arith.constant 0 : index
    %24 = vector.load %arg9[%c0_16, %c0_17] : memref<1x256xf32, #tpu.memory_space<vmem>>, vector<1x256xf32>
    %c0_18 = arith.constant 0 : index
    %c0_19 = arith.constant 0 : index
    %25 = vector.load %arg8[%c0_18, %c0_19] : memref<1x256xf32, #tpu.memory_space<vmem>>, vector<1x256xf32>
    %cst_20 = arith.constant dense<0.000000e+00> : vector<8x256xf32>
    %26 = tpu.matmul %21, %23, %cst_20 {dimension_numbers = #tpu.dot_dimension_numbers<[1], [0], [0], [1], [0, 0, 1, 1], [], []>} : vector<8x512xbf16>, vector<512x256xbf16>, vector<8x256xf32> -> vector<8x256xf32>
    %27 = vector.broadcast %25 : vector<1x256xf32> to vector<8x256xf32>
    %28 = arith.mulf %26, %27 : vector<8x256xf32>
    %29 = vector.broadcast %24 : vector<1x256xf32> to vector<8x256xf32>
    %30 = arith.addf %28, %29 : vector<8x256xf32>
    %cst_21 = arith.constant 0.000000e+00 : f32
    %31 = vector.broadcast %cst_21 : f32 to vector<8x256xf32>
    %32 = arith.maximumf %30, %31 : vector<8x256xf32>
    %33 = arith.truncf %32 : vector<8x256xf32> to vector<8x256xbf16>
    %c0_22 = arith.constant 0 : index
    %c0_23 = arith.constant 0 : index
    %34 = vector.load %arg10[%c0_22, %c0_23] : memref<256x512xi8, #tpu.memory_space<vmem>>, vector<256x512xi8>
    %35 = arith.sitofp %34 : vector<256x512xi8> to vector<256x512xbf16>
    %c0_24 = arith.constant 0 : index
    %c0_25 = arith.constant 0 : index
    %36 = vector.load %arg12[%c0_24, %c0_25] : memref<1x512xf32, #tpu.memory_space<vmem>>, vector<1x512xf32>
    %c0_26 = arith.constant 0 : index
    %c0_27 = arith.constant 0 : index
    %37 = vector.load %arg11[%c0_26, %c0_27] : memref<1x512xf32, #tpu.memory_space<vmem>>, vector<1x512xf32>
    %cst_28 = arith.constant dense<0.000000e+00> : vector<8x512xf32>
    %38 = tpu.matmul %33, %35, %cst_28 {dimension_numbers = #tpu.dot_dimension_numbers<[1], [0], [0], [1], [0, 0, 1, 1], [], []>} : vector<8x256xbf16>, vector<256x512xbf16>, vector<8x512xf32> -> vector<8x512xf32>
    %39 = vector.broadcast %37 : vector<1x512xf32> to vector<8x512xf32>
    %40 = arith.mulf %38, %39 : vector<8x512xf32>
    %41 = vector.broadcast %36 : vector<1x512xf32> to vector<8x512xf32>
    %42 = arith.addf %40, %41 : vector<8x512xf32>
    %cst_29 = arith.constant 0.000000e+00 : f32
    %43 = vector.broadcast %cst_29 : f32 to vector<8x512xf32>
    %44 = arith.maximumf %42, %43 : vector<8x512xf32>
    %45 = arith.truncf %44 : vector<8x512xf32> to vector<8x512xbf16>
    %c0_30 = arith.constant 0 : index
    %c0_31 = arith.constant 0 : index
    %46 = vector.load %arg13[%c0_30, %c0_31] : memref<512x4xbf16, #tpu.memory_space<vmem>>, vector<512x4xbf16>
    %c0_32 = arith.constant 0 : index
    %c0_33 = arith.constant 0 : index
    %47 = vector.load %arg14[%c0_32, %c0_33] : memref<1x4xf32, #tpu.memory_space<vmem>>, vector<1x4xf32>
    %cst_34 = arith.constant dense<0.000000e+00> : vector<8x4xf32>
    %48 = tpu.matmul %45, %46, %cst_34 {dimension_numbers = #tpu.dot_dimension_numbers<[1], [0], [0], [1], [0, 0, 1, 1], [], []>} : vector<8x512xbf16>, vector<512x4xbf16>, vector<8x4xf32> -> vector<8x4xf32>
    %49 = vector.broadcast %47 : vector<1x4xf32> to vector<8x4xf32>
    %50 = arith.addf %48, %49 : vector<8x4xf32>
    %c0_35 = arith.constant 0 : index
    %c0_36 = arith.constant 0 : index
    %51 = vector.load %arg15[%c0_35, %c0_36] : memref<8x4xf32, #tpu.memory_space<vmem>>, vector<8x4xf32>
    tpu.vector_store %arg15[%c0_35, %c0_36], %50 {strides = array<i32>} : memref<8x4xf32, #tpu.memory_space<vmem>>, vector<8x4xf32>,
    return
  }
  func.func @transform_0(%arg0: i32) -> (i32, i32) {
    %c0_i32 = arith.constant 0 : i32
    %c0_i32_0 = arith.constant 0 : i32
    %c0_i32_1 = arith.constant 0 : i32
    return %c0_i32, %c0_i32_0 : i32, i32
  }
  func.func @transform_1(%arg0: i32) -> (i32, i32) {
    %c0_i32 = arith.constant 0 : i32
    %c0_i32_0 = arith.constant 0 : i32
    %c0_i32_1 = arith.constant 0 : i32
    return %c0_i32, %c0_i32_0 : i32, i32
  }
  func.func @transform_2(%arg0: i32) -> (i32, i32) {
    %c0_i32 = arith.constant 0 : i32
    %c0_i32_0 = arith.constant 0 : i32
    %c0_i32_1 = arith.constant 0 : i32
    return %c0_i32, %c0_i32_0 : i32, i32
  }
  func.func @transform_3(%arg0: i32) -> (i32, i32) {
    %c0_i32 = arith.constant 0 : i32
    %c0_i32_0 = arith.constant 0 : i32
    %c0_i32_1 = arith.constant 0 : i32
    return %c0_i32, %c0_i32_0 : i32, i32
  }
  func.func @transform_4(%arg0: i32) -> (i32, i32) {
    %c0_i32 = arith.constant 0 : i32
    %c0_i32_0 = arith.constant 0 : i32
    %c0_i32_1 = arith.constant 0 : i32
    return %c0_i32, %c0_i32_0 : i32, i32
  }
  func.func @transform_5(%arg0: i32) -> (i32, i32) {
    %c0_i32 = arith.constant 0 : i32
    %c0_i32_0 = arith.constant 0 : i32
    %c0_i32_1 = arith.constant 0 : i32
    return %c0_i32, %c0_i32_0 : i32, i32
  }
  func.func @transform_6(%arg0: i32) -> (i32, i32) {
    %c0_i32 = arith.constant 0 : i32
    %c0_i32_0 = arith.constant 0 : i32
    %c0_i32_1 = arith.constant 0 : i32
    return %c0_i32, %c0_i32_0 : i32, i32
  }
  func.func @transform_7(%arg0: i32) -> (i32, i32) {
    %c0_i32 = arith.constant 0 : i32
    %c0_i32_0 = arith.constant 0 : i32
    %c0_i32_1 = arith.constant 0 : i32
    return %c0_i32, %c0_i32_0 : i32, i32
  }
  func.func @transform_8(%arg0: i32) -> (i32, i32) {
    %c0_i32 = arith.constant 0 : i32
    %c0_i32_0 = arith.constant 0 : i32
    %c0_i32_1 = arith.constant 0 : i32
    return %c0_i32, %c0_i32_0 : i32, i32
  }
  func.func @transform_9(%arg0: i32) -> (i32, i32) {
    %c0_i32 = arith.constant 0 : i32
    %c0_i32_0 = arith.constant 0 : i32
    %c0_i32_1 = arith.constant 0 : i32
    return %c0_i32, %c0_i32_0 : i32, i32
  }
  func.func @transform_10(%arg0: i32) -> (i32, i32) {
    %c0_i32 = arith.constant 0 : i32
    %c0_i32_0 = arith.constant 0 : i32
    %c0_i32_1 = arith.constant 0 : i32
    return %c0_i32, %c0_i32_0 : i32, i32
  }
  func.func @transform_11(%arg0: i32) -> (i32, i32) {
    %c0_i32 = arith.constant 0 : i32
    %c0_i32_0 = arith.constant 0 : i32
    %c0_i32_1 = arith.constant 0 : i32
    return %c0_i32, %c0_i32_0 : i32, i32
  }
  func.func @transform_12(%arg0: i32) -> (i32, i32) {
    %c0_i32 = arith.constant 0 : i32
    %c0_i32_0 = arith.constant 0 : i32
    %c0_i32_1 = arith.constant 0 : i32
    return %c0_i32, %c0_i32_0 : i32, i32
  }
  func.func @transform_13(%arg0: i32) -> (i32, i32) {
    %c0_i32 = arith.constant 0 : i32
    %c0_i32_0 = arith.constant 0 : i32
    %c0_i32_1 = arith.constant 0 : i32
    return %c0_i32, %c0_i32_0 : i32, i32
  }
  func.func @transform_14(%arg0: i32) -> (i32, i32) {
    %c0_i32 = arith.constant 0 : i32
    %c0_i32_0 = arith.constant 0 : i32
    %c0_i32_1 = arith.constant 0 : i32
    return %c0_i32, %c0_i32_0 : i32, i32
  }
}

</mosaic_0001>

<bundles_post_ra>
// kernel: nn_hopper_forward.1
= control target key start
LH: loop header
LB: loop body
LE: loop exit
PB: predicated region body
PF: predicated region fallthrough
CT: control target
= control target key end

     0   :  { %19 = vsyncpa [#allocation3], 0  ;;  %s2820_s0 = inlined_call_operand.vmem [shape: f32[8,11], index: 0, kind: input, shape index: {}]   ;;  %s2821_s1 = inlined_call_operand.hbm [shape: bf16[11,1024], index: 1, kind: input, shape index: {}]   ;;  %s2822_s2 = inlined_call_operand.vmem [shape: f32[1,1024], index: 2, kind: input, shape index: {}]   ;;  %s2823_s3 = inlined_call_operand.hbm [shape: s8[1024,512], index: 3, kind: input, shape index: {}]   ;;  %s2824_s4 = inlined_call_operand.hbm [shape: f32[1,512], index: 4, kind: input, shape index: {}]   ;;  %s2825_s5 = inlined_call_operand.hbm [shape: f32[1,512], index: 5, kind: input, shape index: {}]   ;;  %s2826_s6 = inlined_call_operand.vmem [shape: s8[512,256], index: 6, kind: input, shape index: {}]   ;;  %s2827_s7 = inlined_call_operand.hbm [shape: f32[1,256], index: 7, kind: input, shape index: {}]   ;;  %s2828_s8 = inlined_call_operand.vmem [shape: f32[1,256], index: 8, kind: input, shape index: {}]   ;;  %s2829_s9 = inlined_call_operand.hbm [shape: s8[256,512], index: 9, kind: input, shape index: {}]   ;;  %s2830_s10 = inlined_call_operand.hbm [shape: f32[1,512], index: 10, kind: input, shape index: {}]   ;;  %s2831_s11 = inlined_call_operand.hbm [shape: f32[1,512], index: 11, kind: input, shape index: {}]   ;;  %s2832_s12 = inlined_call_operand.vmem [shape: bf16[512,4], index: 12, kind: input, shape index: {}]   ;;  %s2833_s13 = inlined_call_operand.hbm [shape: f32[1,4], index: 13, kind: input, shape index: {}]   ;;  %s2834_s14 = inlined_call_operand.vmem [shape: f32[8,4], index: 14, kind: output, shape index: {}]  }
   0x1   :  { %20 = vsyncpa [#allocation5], 0 }
   0x2   :  { %21 = vsyncpa [#allocation8], 0 }
   0x3   :  { %22 = vsyncpa [#allocation11], 0 }
   0x4   :  { %23 = vsyncpa [#allocation14], 0  ;;  %s2352_s29 = smov [#allocation4]   ;;  %s2353_s15 = smov [#allocation7]  }
   0x5   :  { %s45_s30 = sshll.u32 %s2352_s29, 4  ;;  %s68_s16 = sshll.u32 %s2353_s15, 4  ;;  %s46_s30 = int_to_ptr.vmem [resolvable:$true] %s45_s30  ;;  %s69_s16 = int_to_ptr.vmem [resolvable:$true] %s68_s16 }
   0x6   :  { %s2170_s17 = scalar_lea.vmem %s46_s30, 16384  ;;  %p2175_p1 = scmp.lt.s32.totalorder %s46_s30, %s46_s30 }
   0x7   :  { %p2171_p0 = scmp.ne.s32.totalorder %s46_s30, %s2170_s17  ;;  %p2176_p2 = scmp.lt.s32.totalorder %s2170_s17, %s2170_s17 }
   0x9   :  { %p2177_p3 = por %p2176_p2, %p2175_p1 }
   0xb   :  { %p2178_p4 = pnand %p2177_p3, %p2171_p0 }
   0xd   :  { %2181 = shalt.err (!%p2178_p4)
}
   0xe   :  { %s2354_s18 = smov 512   ;;  %s2355_s19 = smov 32  }
   0xf   :  { %51 = dma.hbm_to_vmem [thread:$0]  %s2823_s3, 16384, %s46_s30, [#allocation5], %s2354_s18, %s2354_s18, %s2355_s19  }
  0x10   :  { %s2190_s22 = scalar_lea.vmem %s69_s16, 64  ;;  %p2195_p6 = scmp.lt.s32.totalorder %s69_s16, %s69_s16 }
  0x11   :  { %p2191_p5 = scmp.ne.s32.totalorder %s69_s16, %s2190_s22  ;;  %p2196_p7 = scmp.lt.s32.totalorder %s2190_s22, %s2190_s22 }
  0x13   :  { %p2197_p8 = por %p2196_p7, %p2195_p6 }
  0x15   :  { %p2198_p9 = pnand %p2197_p8, %p2191_p5 }
  0x17   :  { %2201 = shalt.err (!%p2198_p9)
}
  0x18   :  { %71 = dma.hbm_to_vmem [thread:$0]  %s2825_s5, 64, %s69_s16, [#allocation8]  }
  0x19   :  { %s2356_s25 = smov [#allocation10]   ;;  %s2357_s27 = smov [#allocation13]  }
  0x1a   :  { %s91_s26 = sshll.u32 %s2356_s25, 4  ;;  %s114_s28 = sshll.u32 %s2357_s27, 4  ;;  %s92_s26 = int_to_ptr.vmem [resolvable:$true] %s91_s26  ;;  %s115_s28 = int_to_ptr.vmem [resolvable:$true] %s114_s28 }
  0x1b   :  { %s2210_s29 = scalar_lea.vmem %s92_s26, 4096  ;;  %p2215_p11 = scmp.lt.s32.totalorder %s92_s26, %s92_s26 }
  0x1c   :  { %p2211_p10 = scmp.ne.s32.totalorder %s92_s26, %s2210_s29  ;;  %p2216_p12 = scmp.lt.s32.totalorder %s2210_s29, %s2210_s29 }
  0x1e   :  { %p2217_p13 = por %p2216_p12, %p2215_p11 }
  0x20   :  { %p2218_p0 = pnand %p2217_p13, %p2211_p10 }
  0x22   :  { %2221 = shalt.err (!%p2218_p0)
}
  0x23   :  { %97 = dma.hbm_to_vmem [thread:$0]  %s2829_s9, 4096, %s92_s26, [#allocation11], %s2354_s18, %s2354_s18, %s2355_s19  }
  0x24   :  { %s2230_s5 = scalar_lea.vmem %s115_s28, 64  ;;  %p2235_p2 = scmp.lt.s32.totalorder %s115_s28, %s115_s28 }
  0x25   :  { %p2231_p1 = scmp.ne.s32.totalorder %s115_s28, %s2230_s5  ;;  %p2236_p3 = scmp.lt.s32.totalorder %s2230_s5, %s2230_s5 }
  0x27   :  { %p2237_p4 = por %p2236_p3, %p2235_p2 }
  0x29   :  { %p2238_p5 = pnand %p2237_p4, %p2231_p1 }
  0x2b   :  { %2241 = shalt.err (!%p2238_p5)
}
  0x2c   :  { %117 = dma.hbm_to_vmem [thread:$0]  %s2831_s11, 64, %s115_s28, [#allocation14]  }
  0x2d   :  { %s2358_s17 = smov [#allocation2]   ;;  %s2359_s21 = smov [#allocation6]  }
  0x2e   :  { %s31_s20 = sshll.u32 %s2358_s17, 4  ;;  %s58_s22 = sshll.u32 %s2359_s21, 4  ;;  %s32_s20 = int_to_ptr.vmem [resolvable:$true] %s31_s20  ;;  %s59_s22 = int_to_ptr.vmem [resolvable:$true] %s58_s22 }
  0x2f   :  { %s2250_s23 = scalar_lea.vmem %s32_s20, 1024  ;;  %p2255_p7 = scmp.lt.s32.totalorder %s32_s20, %s32_s20 }
  0x30   :  { %p2251_p6 = scmp.ne.s32.totalorder %s32_s20, %s2250_s23  ;;  %p2256_p8 = scmp.lt.s32.totalorder %s2250_s23, %s2250_s23 }
  0x32   :  { %p2257_p9 = por %p2256_p8, %p2255_p7 }
  0x34   :  { %p2258_p10 = pnand %p2257_p9, %p2251_p6 }
  0x36   :  { %2261 = shalt.err (!%p2258_p10)
}
  0x37   :  { %37 = dma.hbm_to_vmem [thread:$0]  %s2821_s1, 1024, %s32_s20, [#allocation3], %s2354_s18, %s2354_s18, %s2355_s19  }
  0x38   :  { %s2270_s11 = scalar_lea.vmem %s59_s22, 64  ;;  %p2275_p12 = scmp.lt.s32.totalorder %s59_s22, %s59_s22 }
  0x39   :  { %p2271_p11 = scmp.ne.s32.totalorder %s59_s22, %s2270_s11  ;;  %p2276_p13 = scmp.lt.s32.totalorder %s2270_s11, %s2270_s11 }
  0x3b   :  { %p2277_p0 = por %p2276_p13, %p2275_p12 }
  0x3d   :  { %p2278_p1 = pnand %p2277_p0, %p2271_p11 }
  0x3f   :  { %2281 = shalt.err (!%p2278_p1)
}
  0x40   :  { %61 = dma.hbm_to_vmem [thread:$0]  %s2824_s4, 64, %s59_s22, [#allocation5]  }
  0x41   :  { %s2360_s27 = smov [#allocation9]   ;;  %s2361_s29 = smov [#allocation12]  }
  0x42   :  { %s80_s28 = sshll.u32 %s2360_s27, 4  ;;  %s104_s3 = sshll.u32 %s2361_s29, 4  ;;  %s81_s28 = int_to_ptr.vmem [resolvable:$true] %s80_s28  ;;  %s105_s3 = int_to_ptr.vmem [resolvable:$true] %s104_s3 }
  0x43   :  { %s2290_s30 = scalar_lea.vmem %s81_s28, 32  ;;  %p2295_p3 = scmp.lt.s32.totalorder %s81_s28, %s81_s28 }
  0x44   :  { %p2291_p2 = scmp.ne.s32.totalorder %s81_s28, %s2290_s30  ;;  %p2296_p4 = scmp.lt.s32.totalorder %s2290_s30, %s2290_s30 }
  0x46   :  { %p2297_p5 = por %p2296_p4, %p2295_p3 }
  0x48   :  { %p2298_p6 = pnand %p2297_p5, %p2291_p2 }
  0x4a   :  { %2301 = shalt.err (!%p2298_p6)
}
  0x4b   :  { %83 = dma.hbm_to_vmem [thread:$0]  %s2827_s7, 32, %s81_s28, [#allocation8]  }
  0x4c   :  { %s2310_s19 = scalar_lea.vmem %s105_s3, 64  ;;  %p2315_p8 = scmp.lt.s32.totalorder %s105_s3, %s105_s3 }
  0x4d   :  { %p2311_p7 = scmp.ne.s32.totalorder %s105_s3, %s2310_s19  ;;  %p2316_p9 = scmp.lt.s32.totalorder %s2310_s19, %s2310_s19 }
  0x4f   :  { %p2317_p10 = por %p2316_p9, %p2315_p8 }
  0x51   :  { %p2318_p11 = pnand %p2317_p10, %p2311_p7 }
  0x53   :  { %2321 = shalt.err (!%p2318_p11)
}
  0x54   :  { %107 = dma.hbm_to_vmem [thread:$0]  %s2830_s10, 64, %s105_s3, [#allocation11]  }
  0x55   :  { %s2362_s15 = smov [#allocation15]  }
  0x56   :  { %s126_s16 = sshll.u32 %s2362_s15, 4  ;;  %s127_s16 = int_to_ptr.vmem [resolvable:$true] %s126_s16 }
  0x57   :  { %s2330_s17 = scalar_lea.vmem %s127_s16, 16  ;;  %s2334_s20 = scalar_lea.vmem %s127_s16, 32 }
  0x58   :  { %p2331_p12 = scmp.ne.s32.totalorder %s127_s16, %s2330_s17  ;;  %p2335_p13 = scmp.lt.s32.totalorder %s127_s16, %s127_s16 }
  0x59   :  { %p2336_p0 = scmp.lt.s32.totalorder %s2334_s20, %s2330_s17 }
  0x5b   :  { %p2337_p1 = por %p2336_p0, %p2335_p13 }
  0x5d   :  { %p2338_p2 = pnand %p2337_p1, %p2331_p12 }
  0x5f   :  { %2341 = shalt.err (!%p2338_p2)
}
  0x60   :  { %129 = dma.hbm_to_vmem [thread:$0]  %s2833_s13, 16, %s127_s16, [#allocation14]  }
  0x61   :  { %2342 = dma.done.wait [#allocation3], 1024  }
  0x62   :  { %2343 = vsyncadd [#allocation3], 4294966272 }
  0x63   :  { %2344 = dma.done.wait [#allocation5], 16448  }
  0x64   :  { %2345 = vsyncadd [#allocation5], 4294950848 }
  0x65   :  { %2346 = dma.done.wait [#allocation8], 96  }
  0x66   :  { %2347 = vsyncadd [#allocation8], 4294967200 }
  0x67   :  { %2348 = dma.done.wait [#allocation11], 4160  }
  0x68   :  { %2349 = vsyncadd [#allocation11], 4294963136 }
  0x69   :  { %2350 = dma.done.wait [#allocation14], 80  }
  0x6a   :  { %2351 = vsyncadd [#allocation14], 4294967216  ;;  %vm246_vm0 = vcmask 1044480   ;;  %v2363_v0 = vmov 0   ;;  %vm247_vm1 = vcmask 1045504   ;;  %v2364_v1 = vmov 65535  }
  0x6b   :  { %306 = vmatprep.mubr.bf16.mxu0 %v2363_v0  ;;  %347 = vmatprep.mubr.bf16.mxu1 %v2363_v0  ;;  %v248_v2 = vsel %vm246_vm0, 4294967295, %v2364_v1  ;;  %v160_v3 = vld [vmem:[#allocation2] sm:$0xff]  ;;  %v161_v6 = vld [vmem:[#allocation2 + $0x8] sm:$0xff]  ;;  %v162_v11 = vld [vmem:[#allocation2 + $0x10] sm:$0xff]  ;;  %vm242_vm2 = vcmask 89088   ;;  %vm2017_vm3 = vcmask 31744  }
  0x6c   :  { %v164_v4 = vld [vmem:[#allocation2 + $0x20] sm:$0x33]  ;;  %v249_v5 = vsel %vm247_vm1, %v248_v2, 0  ;;  %v165_v8 = vld [vmem:[#allocation2 + $0x28] sm:$0x33]  ;;  %v163_v15 = vld [vmem:[#allocation2 + $0x18] sm:$0xff] }
  0x6d   :  { %v2029_v7 = vcombine.high %v160_v3, %v164_v4  ;;  %v2028_v9 = vcombine.low %v160_v3, %v164_v4  ;;  %v158_v10 = vld [vmem:[%s2820_s0] sm:$0xff]  ;;  %v2031_v12 = vcombine.high %v161_v6, %v165_v8  ;;  %v2030_v13 = vcombine.low %v161_v6, %v165_v8  ;;  %v166_v14 = vld [vmem:[#allocation2 + $0x30] sm:$0x33]  ;;  %v167_v16 = vld [vmem:[#allocation2 + $0x38] sm:$0x33] }
  0x6e   :  { %v2032_v19 = vcombine.low %v162_v11, %v166_v14  ;;  %v2033_v20 = vcombine.high %v162_v11, %v166_v14  ;;  %v2034_v23 = vcombine.low %v163_v15, %v167_v16  ;;  %v2035_v24 = vcombine.high %v163_v15, %v167_v16  ;;  %v467_v27 = vld [vmem:[#allocation4 + $0x68] sm:$0xff]  ;;  %v466_v34 = vld [vmem:[#allocation4 + $0x60] sm:$0xff] }
  0x6f   :  { %v254_v17 = vand.u32 %v2029_v7, %v249_v5  ;;  %v251_v18 = vand.u32 %v2028_v9, %v249_v5  ;;  %v260_v21 = vand.u32 %v2031_v12, %v249_v5  ;;  %v257_v22 = vand.u32 %v2030_v13, %v249_v5  ;;  %v499_v30 = vld [vmem:[#allocation4 + $0x168] sm:$0xff]  ;;  %v498_v35 = vld [vmem:[#allocation4 + $0x160] sm:$0xff] }
  0x70   :  { %v159_v25 = vpack.c.bf16 %v158_v10, %v158_v10  ;;  %v266_v26 = vand.u32 %v2033_v20, %v249_v5  ;;  %v263_v28 = vand.u32 %v2032_v19, %v249_v5  ;;  %v272_v29 = vand.u32 %v2035_v24, %v249_v5  ;;  %v463_v37 = vld [vmem:[#allocation4 + $0x48] sm:$0xff]  ;;  %v462_v42 = vld [vmem:[#allocation4 + $0x40] sm:$0xff] }
  0x71   :  { %288 = vmatprep.subr.bf16.mxu0 %v254_v17  ;;  %329 = vmatprep.subr.bf16.mxu1 %v260_v21  ;;  %v269_v31 = vand.u32 %v2034_v23, %v249_v5  ;;  %v611_v32 = vunpack.c.h.s8.bf16 %v467_v27  ;;  %v675_v33 = vunpack.c.h.s8.bf16 %v499_v30  ;;  %v610_v36 = vunpack.c.h.s8.bf16 %v466_v34  ;;  %v495_v40 = vld [vmem:[#allocation4 + $0x148] sm:$0xff]  ;;  %v494_v44 = vld [vmem:[#allocation4 + $0x140] sm:$0xff] }
  0x72   :  { %289 = vmatpush1.bf16.msra.mxu0 %v251_v18  ;;  %330 = vmatpush1.bf16.msra.mxu1 %v257_v22  ;;  %v674_v38 = vunpack.c.h.s8.bf16 %v498_v35  ;;  %v607_v39 = vunpack.c.l.s8.bf16 %v467_v27  ;;  %v671_v41 = vunpack.c.l.s8.bf16 %v499_v30  ;;  %v606_v43 = vunpack.c.l.s8.bf16 %v466_v34  ;;  %v459_v49 = vld [vmem:[#allocation4 + $0x28] sm:$0xff]  ;;  %v458_v54 = vld [vmem:[#allocation4 + $0x20] sm:$0xff] }
  0x73   :  { %370 = vmatprep.subr.bf16.mxu0 %v266_v26  ;;  %411 = vmatprep.subr.bf16.mxu1 %v272_v29  ;;  %v670_v45 = vunpack.c.l.s8.bf16 %v498_v35  ;;  %v603_v46 = vunpack.c.h.s8.bf16 %v463_v37  ;;  %v667_v47 = vunpack.c.h.s8.bf16 %v495_v40  ;;  %v602_v48 = vunpack.c.h.s8.bf16 %v462_v42  ;;  %v491_v52 = vld [vmem:[#allocation4 + $0x128] sm:$0xff]  ;;  %v490_v56 = vld [vmem:[#allocation4 + $0x120] sm:$0xff] }
  0x74   :  { %v666_v50 = vunpack.c.h.s8.bf16 %v494_v44  ;;  %v599_v51 = vunpack.c.l.s8.bf16 %v463_v37  ;;  %v663_v53 = vunpack.c.l.s8.bf16 %v495_v40  ;;  %v598_v55 = vunpack.c.l.s8.bf16 %v462_v42  ;;  %v455_v61 = vld [vmem:[#allocation4 + $0x8] sm:$0xff]  ;;  %v454_v5 = vld [vmem:[#allocation4] sm:$0xff] }
  0x75   :  { %2036 = vmatmul.mubr.msk.bf16.vlgmr.msra.gmra.mxu0 %vm242_vm2, %v159_v25  ;;  %2037 = vmatmul.mubr.msk.bf16.vlgmr.msra.gmra.mxu1 %vm242_vm2, %v159_v25  ;;  %v662_v57 = vunpack.c.l.s8.bf16 %v494_v44  ;;  %v595_v58 = vunpack.c.h.s8.bf16 %v459_v49  ;;  %v659_v59 = vunpack.c.h.s8.bf16 %v491_v52  ;;  %v594_v60 = vunpack.c.h.s8.bf16 %v458_v54  ;;  %v486_v7 = vld [vmem:[#allocation4 + $0x100] sm:$0xff]  ;;  %v483_v12 = vld [vmem:[#allocation4 + $0xe8] sm:$0xff] }
  0x76   :  { %371 = vmatpush1.bf16.msra.mxu0 %v263_v28  ;;  %388 = vmatprep.mubr.bf16.mxu0 %v2363_v0  ;;  %v658_v62 = vunpack.c.h.s8.bf16 %v490_v56  ;;  %v591_v63 = vunpack.c.l.s8.bf16 %v459_v49  ;;  %v655_v1 = vunpack.c.l.s8.bf16 %v491_v52  ;;  %v590_v2 = vunpack.c.l.s8.bf16 %v458_v54  ;;  %v515_v13 = vld [vmem:[#allocation4 + $0x1e8] sm:$0xff]  ;;  %v482_v17 = vld [vmem:[#allocation4 + $0xe0] sm:$0xff] }
  0x77   :  { %412 = vmatpush1.bf16.msra.mxu1 %v269_v31  ;;  %429 = vmatprep.mubr.bf16.mxu1 %v2363_v0  ;;  %v487_v0 = vld [vmem:[#allocation4 + $0x108] sm:$0xff]  ;;  %v654_v3 = vunpack.c.l.s8.bf16 %v490_v56  ;;  %v587_v4 = vunpack.c.h.s8.bf16 %v455_v61  ;;  %v586_v8 = vunpack.c.h.s8.bf16 %v454_v5  ;;  %v650_v9 = vunpack.c.h.s8.bf16 %v486_v7  ;;  %v514_v19 = vld [vmem:[#allocation4 + $0x1e0] sm:$0xff] }
  0x78   :  { %840 = vmatprep.subr.bf16.mxu0 %v611_v32  ;;  %881 = vmatprep.subr.bf16.mxu1 %v675_v33  ;;  %v651_v6 = vunpack.c.h.s8.bf16 %v487_v0  ;;  %v583_v10 = vunpack.c.l.s8.bf16 %v455_v61  ;;  %v647_v11 = vunpack.c.l.s8.bf16 %v487_v0  ;;  %v582_v14 = vunpack.c.l.s8.bf16 %v454_v5  ;;  %v479_v24 = vld [vmem:[#allocation4 + $0xc8] sm:$0xff]  ;;  %v478_v29 = vld [vmem:[#allocation4 + $0xc0] sm:$0xff] }
  0x79   :  { %v646_v15 = vunpack.c.l.s8.bf16 %v486_v7  ;;  %v643_v16 = vunpack.c.h.s8.bf16 %v483_v12  ;;  %v707_v18 = vunpack.c.h.s8.bf16 %v515_v13  ;;  %v642_v20 = vunpack.c.h.s8.bf16 %v482_v17  ;;  %v510_v31 = vld [vmem:[#allocation4 + $0x1c0] sm:$0xff]  ;;  %v507_v37 = vld [vmem:[#allocation4 + $0x1a8] sm:$0xff] }
  0x7a   :  { %v706_v21 = vunpack.c.h.s8.bf16 %v514_v19  ;;  %v639_v22 = vunpack.c.l.s8.bf16 %v483_v12  ;;  %v703_v23 = vunpack.c.l.s8.bf16 %v515_v13  ;;  %v638_v26 = vunpack.c.l.s8.bf16 %v482_v17  ;;  %v470_v54 = vld [vmem:[#allocation4 + $0x80] sm:$0xff] }
  0x7b   :  { %v702_v27 = vunpack.c.l.s8.bf16 %v514_v19  ;;  %v635_v28 = vunpack.c.h.s8.bf16 %v479_v24  ;;  %v634_v32 = vunpack.c.h.s8.bf16 %v478_v29  ;;  %v698_v33 = vunpack.c.h.s8.bf16 %v510_v31  ;;  %v2494_v5 = vld [vmem:[%s2822_s2] sm:$0xff] }
  0x7c   :  { %v631_v34 = vunpack.c.l.s8.bf16 %v479_v24  ;;  %v691_v42 = vunpack.c.h.s8.bf16 %v507_v37  ;;  %v618_v56 = vunpack.c.h.s8.bf16 %v470_v54 }
  0x7d   :  { %2038 = vmatmul.mubr.msk.bf16.vlgmr.msra.gmra.mxu0 %vm242_vm2, %v159_v25  ;;  %2039 = vmatmul.mubr.msk.bf16.vlgmr.msra.gmra.mxu1 %vm242_vm2, %v159_v25  ;;  %v511_v25 = vld [vmem:[#allocation4 + $0x1c8] sm:$0xff] }
  0x7e   :  { %841 = vmatpush1.bf16.msra.mxu0 %v610_v36  ;;  %882 = vmatpush1.bf16.msra.mxu1 %v674_v38  ;;  %v699_v30 = vunpack.c.h.s8.bf16 %v511_v25  ;;  %v695_v35 = vunpack.c.l.s8.bf16 %v511_v25  ;;  %v475_v36 = vld [vmem:[#allocation4 + $0xa8] sm:$0xff]  ;;  %v630_v38 = vunpack.c.l.s8.bf16 %v478_v29 }
  0x7f   :  { %842 = vmatprep.subr.bf16.mxu0 %v607_v39  ;;  %883 = vmatprep.subr.bf16.mxu1 %v671_v41  ;;  %v694_v39 = vunpack.c.l.s8.bf16 %v510_v31  ;;  %v627_v40 = vunpack.c.h.s8.bf16 %v475_v36  ;;  %v474_v41 = vld [vmem:[#allocation4 + $0xa0] sm:$0xff] }
  0x80   :  { %v626_v44 = vunpack.c.h.s8.bf16 %v474_v41 }
  0x82   :  { %843 = vmatpush1.bf16.msra.mxu0 %v606_v43  ;;  %884 = vmatpush1.bf16.msra.mxu1 %v670_v45  ;;  %v506_v43 = vld [vmem:[#allocation4 + $0x1a0] sm:$0xff] }
  0x83   :  { %844 = vmatprep.subr.bf16.mxu0 %v603_v46  ;;  %885 = vmatprep.subr.bf16.mxu1 %v667_v47  ;;  %v690_v45 = vunpack.c.h.s8.bf16 %v506_v43  ;;  %v623_v46 = vunpack.c.l.s8.bf16 %v475_v36  ;;  %v687_v47 = vunpack.c.l.s8.bf16 %v507_v37  ;;  %v686_v49 = vunpack.c.l.s8.bf16 %v506_v43 }
  0x86   :  { %845 = vmatpush1.bf16.msra.mxu0 %v602_v48  ;;  %886 = vmatpush1.bf16.msra.mxu1 %v666_v50  ;;  %v622_v48 = vunpack.c.l.s8.bf16 %v474_v41  ;;  %v471_v50 = vld [vmem:[#allocation4 + $0x88] sm:$0xff] }
  0x87   :  { %846 = vmatprep.subr.bf16.mxu0 %v599_v51  ;;  %887 = vmatprep.subr.bf16.mxu1 %v663_v53  ;;  %v503_v51 = vld [vmem:[#allocation4 + $0x188] sm:$0xff]  ;;  %v619_v52 = vunpack.c.h.s8.bf16 %v471_v50 }
  0x88   :  { %v683_v53 = vunpack.c.h.s8.bf16 %v503_v51 }
  0x8a   :  { %847 = vmatpush1.bf16.msra.mxu0 %v598_v55  ;;  %888 = vmatpush1.bf16.msra.mxu1 %v662_v57  ;;  %v502_v55 = vld [vmem:[#allocation4 + $0x180] sm:$0xff] }
  0x8b   :  { %848 = vmatprep.subr.bf16.mxu0 %v595_v58  ;;  %889 = vmatprep.subr.bf16.mxu1 %v659_v59  ;;  %v682_v57 = vunpack.c.h.s8.bf16 %v502_v55  ;;  %v615_v58 = vunpack.c.l.s8.bf16 %v471_v50  ;;  %v679_v59 = vunpack.c.l.s8.bf16 %v503_v51  ;;  %v678_v61 = vunpack.c.l.s8.bf16 %v502_v55 }
  0x8e   :  { %849 = vmatpush1.bf16.msra.mxu0 %v594_v60  ;;  %890 = vmatpush1.bf16.msra.mxu1 %v658_v62  ;;  %v614_v60 = vunpack.c.l.s8.bf16 %v470_v54  ;;  %v531_v62 = vld [vmem:[#allocation4 + $0x268] sm:$0xff] }
  0x8f   :  { %850 = vmatprep.subr.bf16.mxu0 %v591_v63  ;;  %891 = vmatprep.subr.bf16.mxu1 %v655_v1  ;;  %v2483_v63 = vld [vmem:[#allocation4 + $0x368] sm:$0xff]  ;;  %v739_v0 = vunpack.c.h.s8.bf16 %v531_v62 }
  0x90   :  { %v803_v1 = vunpack.c.h.s8.bf16 %v2483_v63  ;;  %v799_v43 = vunpack.c.l.s8.bf16 %v2483_v63 }
  0x92   :  { %851 = vmatpush1.bf16.msra.mxu0 %v590_v2  ;;  %892 = vmatpush1.bf16.msra.mxu1 %v654_v3  ;;  %v170_v2 = vlaneseq }
  0x93   :  { %852 = vmatprep.subr.bf16.mxu0 %v587_v4  ;;  %893 = vmatprep.subr.bf16.mxu1 %v651_v6 }
  0x94   :  { %v2486_v3 = vshrl.u32 %v170_v2, 7 }
  0x96   :  { %853 = vmatpush1.bf16.msra.mxu0 %v586_v8  ;;  %894 = vmatpush1.bf16.msra.mxu1 %v650_v9  ;;  %v2489_v4 = vsub.s32 0, %v2486_v3  ;;  %v2497_v6 = vsub.s32 2, %v2486_v3  ;;  %v2500_v7 = vsub.s32 1, %v2486_v3  ;;  %v2503_v8 = vsub.s32 3, %v2486_v3 }
  0x97   :  { %854 = vmatprep.subr.bf16.mxu0 %v583_v10  ;;  %895 = vmatprep.subr.bf16.mxu1 %v647_v11 }
  0x98   :  { %v173_v9 = vrot.slane %v2494_v5, %v2489_v4  ;;  %v181_v10 = vrot.slane %v2494_v5, %v2497_v6  ;;  %v177_v11 = vrot.slane %v2494_v5, %v2500_v7  ;;  %v185_v13 = vrot.slane %v2494_v5, %v2503_v8 }
  0x9a   :  { %855 = vmatpush1.bf16.msra.mxu0 %v582_v14  ;;  %896 = vmatpush1.bf16.msra.mxu1 %v646_v15 }
  0x9b   :  { %856 = vmatprep.subr.bf16.mxu0 %v643_v16  ;;  %897 = vmatprep.subr.bf16.mxu1 %v707_v18 }
  0x9e   :  { %857 = vmatpush2.bf16.msra.mxu0 %v642_v20  ;;  %898 = vmatpush2.bf16.msra.mxu1 %v706_v21  ;;  %v530_v20 = vld [vmem:[#allocation4 + $0x260] sm:$0xff]  ;;  %v192_v21 = vsub.s32 5, %v2486_v3 }
  0x9f   :  { %858 = vmatprep.subr.bf16.mxu0 %v639_v22  ;;  %899 = vmatprep.subr.bf16.mxu1 %v703_v23 }
  0xa0   :  { %v193_v37 = vrot.slane %v2494_v5, %v192_v21 }
  0xa2   :  { %859 = vmatpush2.bf16.msra.mxu0 %v638_v26  ;;  %900 = vmatpush2.bf16.msra.mxu1 %v702_v27  ;;  %v562_v26 = vld [vmem:[#allocation4 + $0x360] sm:$0xff]  ;;  %v200_v27 = vsub.s32 7, %v2486_v3 }
  0xa3   :  { %860 = vmatprep.subr.bf16.mxu0 %v635_v28  ;;  %901 = vmatprep.subr.bf16.mxu1 %v699_v30  ;;  %v802_v36 = vunpack.c.h.s8.bf16 %v562_v26  ;;  %v798_v51 = vunpack.c.l.s8.bf16 %v562_v26 }
  0xa6   :  { %861 = vmatpush2.bf16.msra.mxu0 %v634_v32  ;;  %902 = vmatpush2.bf16.msra.mxu1 %v698_v33  ;;  %v738_v32 = vunpack.c.h.s8.bf16 %v530_v20 }
  0xa7   :  { %862 = vmatprep.subr.bf16.mxu0 %v631_v34  ;;  %903 = vmatprep.subr.bf16.mxu1 %v695_v35 }
  0xaa   :  { %863 = vmatpush2.bf16.msra.mxu0 %v630_v38  ;;  %904 = vmatpush2.bf16.msra.mxu1 %v694_v39 }
  0xab   :  { %864 = vmatprep.subr.bf16.mxu0 %v627_v40  ;;  %905 = vmatprep.subr.bf16.mxu1 %v691_v42  ;;  %v735_v40 = vunpack.c.l.s8.bf16 %v531_v62  ;;  %v201_v42 = vrot.slane %v2494_v5, %v200_v27 }
  0xae   :  { %865 = vmatpush2.bf16.msra.mxu0 %v626_v44  ;;  %906 = vmatpush2.bf16.msra.mxu1 %v690_v45  ;;  %v527_v44 = vld [vmem:[#allocation4 + $0x248] sm:$0xff] }
  0xaf   :  { %866 = vmatprep.subr.bf16.mxu0 %v623_v46  ;;  %907 = vmatprep.subr.bf16.mxu1 %v687_v47  ;;  %v559_v46 = vld [vmem:[#allocation4 + $0x348] sm:$0xff]  ;;  %v727_v2 = vunpack.c.l.s8.bf16 %v527_v44 }
  0xb2   :  { %867 = vmatpush2.bf16.msra.mxu0 %v622_v48  ;;  %908 = vmatpush2.bf16.msra.mxu1 %v686_v49  ;;  %v734_v48 = vunpack.c.l.s8.bf16 %v530_v20 }
  0xb3   :  { %868 = vmatprep.subr.bf16.mxu0 %v619_v52  ;;  %909 = vmatprep.subr.bf16.mxu1 %v683_v53  ;;  %v731_v52 = vunpack.c.h.s8.bf16 %v527_v44  ;;  %v526_v53 = vld [vmem:[#allocation4 + $0x240] sm:$0xff] }
  0xb4   :  { %v730_v62 = vunpack.c.h.s8.bf16 %v526_v53 }
  0xb6   :  { %869 = vmatpush2.bf16.msra.mxu0 %v618_v56  ;;  %910 = vmatpush2.bf16.msra.mxu1 %v682_v57  ;;  %v795_v56 = vunpack.c.h.s8.bf16 %v559_v46  ;;  %v558_v57 = vld [vmem:[#allocation4 + $0x340] sm:$0xff] }
  0xb7   :  { %870 = vmatprep.subr.bf16.mxu0 %v615_v58  ;;  %911 = vmatprep.subr.bf16.mxu1 %v679_v59 }
  0xba   :  { %871 = vmatpush2.bf16.msra.mxu0 %v614_v60  ;;  %912 = vmatpush2.bf16.msra.mxu1 %v678_v61 }
  0xbb   :  { %922 = vmatprep.subr.bf16.mxu0 %v739_v0  ;;  %963 = vmatprep.subr.bf16.mxu1 %v803_v1  ;;  %v794_v1 = vunpack.c.h.s8.bf16 %v558_v57 }
 0x135   :  { %v308_v12 = vpop.f32.mrf.mxu0  ;;  %v349_v15 = vpop.f32.mrf.mxu1 }
 0x136   :  { %v309_v14 = vadd.f32 %v308_v12, %v173_v9  ;;  %v350_v16 = vadd.f32 %v349_v15, %v181_v10  ;;  %v791_v10 = vunpack.c.l.s8.bf16 %v559_v46  ;;  %v555_v12 = vld [vmem:[#allocation4 + $0x328] sm:$0xff]  ;;  %v546_v46 = vld [vmem:[#allocation4 + $0x2e0] sm:$0xff] }
 0x137   :  { %v310_v17 = vpop.f32.mrf.mxu0  ;;  %v351_v19 = vpop.f32.mrf.mxu1 }
 0x138   :  { %v311_v18 = vadd.f32 %v310_v17, %v177_v11  ;;  %v438_v22 = vmax.f32 %v309_v14, 0.0  ;;  %v440_v23 = vmax.f32 %v350_v16, 0.0  ;;  %v352_v24 = vadd.f32 %v351_v19, %v185_v13  ;;  %v523_v11 = vld [vmem:[#allocation4 + $0x228] sm:$0xff]  ;;  %v522_v16 = vld [vmem:[#allocation4 + $0x220] sm:$0xff] }
 0x139   :  { %v312_v25 = vpop.f32.mrf.mxu0  ;;  %v353_v29 = vpop.f32.mrf.mxu1  ;;  %v726_v13 = vunpack.c.l.s8.bf16 %v526_v53  ;;  %v790_v14 = vunpack.c.l.s8.bf16 %v558_v57  ;;  %v723_v15 = vunpack.c.h.s8.bf16 %v523_v11  ;;  %v787_v17 = vunpack.c.h.s8.bf16 %v555_v12  ;;  %v543_v53 = vld [vmem:[#allocation4 + $0x2c8] sm:$0xff] }
 0x13a   :  { %v439_v28 = vmax.f32 %v311_v18, 0.0  ;;  %v441_v30 = vmax.f32 %v352_v24, 0.0  ;;  %v2515_v33 = vpack.c.bf16 %v440_v23, %v440_v23  ;;  %v2520_v38 = vpack.c.bf16 %v438_v22, %v438_v22  ;;  %v554_v18 = vld [vmem:[#allocation4 + $0x320] sm:$0xff]  ;;  %v519_v23 = vld [vmem:[#allocation4 + $0x208] sm:$0xff] }
 0x13b   :  { %v313_v31 = vpop.f32.mrf.mxu0  ;;  %v354_v35 = vpop.f32.mrf.mxu1  ;;  %v722_v19 = vunpack.c.h.s8.bf16 %v522_v16  ;;  %v786_v20 = vunpack.c.h.s8.bf16 %v554_v18  ;;  %v719_v21 = vunpack.c.l.s8.bf16 %v523_v11  ;;  %v783_v22 = vunpack.c.l.s8.bf16 %v555_v12  ;;  %v551_v24 = vld [vmem:[#allocation4 + $0x308] sm:$0xff] }
 0x13c   :  { %v2517_v34 = vpack.c.bf16 %v439_v28, %v439_v28  ;;  %v2522_v39 = vpack.c.bf16 %v441_v30, %v441_v30  ;;  %v718_v25 = vunpack.c.l.s8.bf16 %v522_v16  ;;  %v782_v26 = vunpack.c.l.s8.bf16 %v554_v18  ;;  %v518_v28 = vld [vmem:[#allocation4 + $0x200] sm:$0xff] }
 0x13d   :  { %v2524_v41 = vpop.f32.mrf.mxu0  ;;  %v2529_v45 = vpop.f32.mrf.mxu1  ;;  %v715_v27 = vunpack.c.h.s8.bf16 %v519_v23  ;;  %v779_v29 = vunpack.c.h.s8.bf16 %v551_v24  ;;  %v550_v30 = vld [vmem:[#allocation4 + $0x300] sm:$0xff]  ;;  %v714_v31 = vunpack.c.h.s8.bf16 %v518_v28  ;;  %v711_v35 = vunpack.c.l.s8.bf16 %v519_v23  ;;  %v535_v23 = vld [vmem:[#allocation4 + $0x288] sm:$0xff] }
 0x13e   :  { %872 = vmatprep.mubr.bf16.mxu0 %v2517_v34  ;;  %913 = vmatprep.mubr.bf16.mxu1 %v2522_v39  ;;  %v763_v57 = vunpack.c.h.s8.bf16 %v543_v53  ;;  %v570_v16 = vld [vmem:[#allocation4 + $0x3a0] sm:$0xff]  ;;  %v196_v18 = vsub.s32 6, %v2486_v3 }
 0x13f   :  { %873 = vmatmul.mubr.bf16.vlgmr.msra.gmra.mxu0 %v2520_v38  ;;  %v392_v47 = vpop.f32.mrf.mxu0  ;;  %914 = vmatmul.mubr.bf16.vlgmr.msra.gmra.mxu1 %v2515_v33  ;;  %v433_v50 = vpop.f32.mrf.mxu1 }
 0x140   :  { %923 = vmatpush1.bf16.msra.mxu0 %v738_v32  ;;  %v393_v49 = vadd.f32 %v392_v47, %v193_v37  ;;  %964 = vmatpush1.bf16.msra.mxu1 %v802_v36  ;;  %v434_v55 = vadd.f32 %v433_v50, %v201_v42  ;;  %v778_v32 = vunpack.c.h.s8.bf16 %v550_v30  ;;  %v775_v36 = vunpack.c.l.s8.bf16 %v551_v24  ;;  %v547_v37 = vld [vmem:[#allocation4 + $0x2e8] sm:$0xff] }
 0x141   :  { %924 = vmatprep.subr.bf16.mxu0 %v735_v40  ;;  %v394_v54 = vpop.f32.mrf.mxu0  ;;  %965 = vmatprep.subr.bf16.mxu1 %v799_v43  ;;  %v435_v59 = vpop.f32.mrf.mxu1  ;;  %v579_v40 = vld [vmem:[#allocation4 + $0x3e8] sm:$0xff]  ;;  %v710_v42 = vunpack.c.l.s8.bf16 %v518_v28  ;;  %v774_v43 = vunpack.c.l.s8.bf16 %v550_v30  ;;  %v771_v44 = vunpack.c.h.s8.bf16 %v547_v37  ;;  %v814_v28 = vunpack.c.l.s8.bf16 %v570_v16  ;;  %v534_v30 = vld [vmem:[#allocation4 + $0x280] sm:$0xff] }
 0x142   :  { %v443_v58 = vmax.f32 %v393_v49, 0.0  ;;  %v445_v60 = vmax.f32 %v434_v55, 0.0  ;;  %v835_v47 = vunpack.c.h.s8.bf16 %v579_v40  ;;  %v770_v49 = vunpack.c.h.s8.bf16 %v546_v46  ;;  %v575_v54 = vld [vmem:[#allocation4 + $0x3c8] sm:$0xff] }
 0x143   :  { %v395_v61 = vpop.f32.mrf.mxu0  ;;  %v436_v0 = vpop.f32.mrf.mxu1  ;;  %v766_v55 = vunpack.c.l.s8.bf16 %v546_v46  ;;  %v827_v59 = vunpack.c.h.s8.bf16 %v575_v54  ;;  %v567_v24 = vld [vmem:[#allocation4 + $0x388] sm:$0xff]  ;;  %v742_v46 = vunpack.c.l.s8.bf16 %v534_v30 }
 0x144   :  { %925 = vmatpush1.bf16.msra.mxu0 %v734_v48  ;;  %v2534_v63 = vpack.c.bf16 %v443_v58, %v443_v58  ;;  %966 = vmatpush1.bf16.msra.mxu1 %v798_v51  ;;  %v2536_v9 = vpack.c.bf16 %v445_v60, %v445_v60  ;;  %v578_v48 = vld [vmem:[#allocation4 + $0x3e0] sm:$0xff]  ;;  %v767_v51 = vunpack.c.l.s8.bf16 %v547_v37  ;;  %v759_v0 = vunpack.c.l.s8.bf16 %v543_v53 }
 0x145   :  { %926 = vmatprep.subr.bf16.mxu0 %v731_v52  ;;  %967 = vmatprep.subr.bf16.mxu1 %v795_v56  ;;  %v834_v50 = vunpack.c.h.s8.bf16 %v578_v48  ;;  %v831_v52 = vunpack.c.l.s8.bf16 %v579_v40  ;;  %v830_v56 = vunpack.c.l.s8.bf16 %v578_v48  ;;  %v542_v58 = vld [vmem:[#allocation4 + $0x2c0] sm:$0xff]  ;;  %v743_v40 = vunpack.c.l.s8.bf16 %v535_v23 }
 0x146   :  { %954 = vmatprep.mubr.bf16.mxu0 %v2534_v63  ;;  %995 = vmatprep.mubr.bf16.mxu1 %v2536_v9  ;;  %v574_v60 = vld [vmem:[#allocation4 + $0x3c0] sm:$0xff]  ;;  %v762_v61 = vunpack.c.h.s8.bf16 %v542_v58  ;;  %v758_v11 = vunpack.c.l.s8.bf16 %v542_v58  ;;  %v497_v58 = vld [vmem:[#allocation4 + $0x158] sm:$0xff] }
 0x147   :  { %v822_v12 = vunpack.c.l.s8.bf16 %v574_v60 }
 0x148   :  { %927 = vmatpush1.bf16.msra.mxu0 %v730_v62  ;;  %968 = vmatpush1.bf16.msra.mxu1 %v794_v1  ;;  %v826_v62 = vunpack.c.h.s8.bf16 %v574_v60  ;;  %v823_v1 = vunpack.c.l.s8.bf16 %v575_v54 }
 0x149   :  { %928 = vmatprep.subr.bf16.mxu0 %v727_v2  ;;  %969 = vmatprep.subr.bf16.mxu1 %v791_v10  ;;  %v539_v2 = vld [vmem:[#allocation4 + $0x2a8] sm:$0xff] }
 0x14a   :  { %v571_v10 = vld [vmem:[#allocation4 + $0x3a8] sm:$0xff] }
 0x14c   :  { %929 = vmatpush1.bf16.msra.mxu0 %v726_v13  ;;  %970 = vmatpush1.bf16.msra.mxu1 %v790_v14  ;;  %v755_v13 = vunpack.c.h.s8.bf16 %v539_v2  ;;  %v538_v14 = vld [vmem:[#allocation4 + $0x2a0] sm:$0xff] }
 0x14d   :  { %930 = vmatprep.subr.bf16.mxu0 %v723_v15  ;;  %971 = vmatprep.subr.bf16.mxu1 %v787_v17  ;;  %v819_v15 = vunpack.c.h.s8.bf16 %v571_v10  ;;  %v754_v17 = vunpack.c.h.s8.bf16 %v538_v14 }
 0x150   :  { %931 = vmatpush1.bf16.msra.mxu0 %v722_v19  ;;  %972 = vmatpush1.bf16.msra.mxu1 %v786_v20  ;;  %v188_v19 = vsub.s32 4, %v2486_v3  ;;  %v818_v20 = vunpack.c.h.s8.bf16 %v570_v16  ;;  %v566_v3 = vld [vmem:[#allocation4 + $0x380] sm:$0xff]  ;;  %v460_v16 = vld [vmem:[#allocation4 + $0x30] sm:$0xff] }
 0x151   :  { %932 = vmatprep.subr.bf16.mxu0 %v719_v21  ;;  %973 = vmatprep.subr.bf16.mxu1 %v783_v22  ;;  %v751_v21 = vunpack.c.l.s8.bf16 %v539_v2  ;;  %v815_v22 = vunpack.c.l.s8.bf16 %v571_v10  ;;  %v810_v37 = vunpack.c.h.s8.bf16 %v566_v3  ;;  %v806_v48 = vunpack.c.l.s8.bf16 %v566_v3 }
 0x154   :  { %933 = vmatpush1.bf16.msra.mxu0 %v718_v25  ;;  %974 = vmatpush1.bf16.msra.mxu1 %v782_v26  ;;  %v197_v25 = vrot.slane %v2494_v5, %v196_v18  ;;  %v750_v26 = vunpack.c.l.s8.bf16 %v538_v14  ;;  %v492_v18 = vld [vmem:[#allocation4 + $0x130] sm:$0xff] }
 0x155   :  { %934 = vmatprep.subr.bf16.mxu0 %v715_v27  ;;  %975 = vmatprep.subr.bf16.mxu1 %v779_v29  ;;  %v189_v27 = vrot.slane %v2494_v5, %v188_v19  ;;  %v747_v29 = vunpack.c.h.s8.bf16 %v535_v23  ;;  %v807_v5 = vunpack.c.l.s8.bf16 %v567_v24  ;;  %v596_v19 = vunpack.c.h.s8.bf16 %v460_v16  ;;  %v457_v23 = vld [vmem:[#allocation4 + $0x18] sm:$0xff] }
 0x158   :  { %935 = vmatpush1.bf16.msra.mxu0 %v714_v31  ;;  %976 = vmatpush1.bf16.msra.mxu1 %v778_v32  ;;  %v811_v31 = vunpack.c.h.s8.bf16 %v567_v24  ;;  %v432_v32 = vadd.f32 %v2529_v45, %v197_v25  ;;  %v489_v24 = vld [vmem:[#allocation4 + $0x118] sm:$0xff]  ;;  %v592_v25 = vunpack.c.l.s8.bf16 %v460_v16 }
 0x159   :  { %936 = vmatprep.subr.bf16.mxu0 %v711_v35  ;;  %977 = vmatprep.subr.bf16.mxu1 %v775_v36  ;;  %v746_v35 = vunpack.c.h.s8.bf16 %v534_v30  ;;  %v391_v36 = vadd.f32 %v2524_v41, %v189_v27  ;;  %v500_v41 = vld [vmem:[#allocation4 + $0x170] sm:$0xff]  ;;  %v589_v27 = vunpack.c.h.s8.bf16 %v457_v23 }
 0x15a   :  { %v676_v54 = vunpack.c.h.s8.bf16 %v500_v41  ;;  %v672_v60 = vunpack.c.l.s8.bf16 %v500_v41  ;;  %v488_v30 = vld [vmem:[#allocation4 + $0x110] sm:$0xff]  ;;  %v513_v41 = vld [vmem:[#allocation4 + $0x1d8] sm:$0xff] }
 0x15b   :  { %v652_v3 = vunpack.c.h.s8.bf16 %v488_v30 }
 0x15c   :  { %937 = vmatpush1.bf16.msra.mxu0 %v710_v42  ;;  %978 = vmatpush1.bf16.msra.mxu1 %v774_v43  ;;  %v469_v42 = vld [vmem:[#allocation4 + $0x78] sm:$0xff] }
 0x15d   :  { %938 = vmatprep.subr.bf16.mxu0 %v771_v44  ;;  %979 = vmatprep.subr.bf16.mxu1 %v835_v47  ;;  %v501_v43 = vld [vmem:[#allocation4 + $0x178] sm:$0xff]  ;;  %v444_v44 = vmax.f32 %v432_v32, 0.0  ;;  %v442_v47 = vmax.f32 %v391_v36, 0.0  ;;  %v613_v45 = vunpack.c.h.s8.bf16 %v469_v42  ;;  %v585_v32 = vunpack.c.l.s8.bf16 %v457_v23 }
 0x15e   :  { %v485_v36 = vld [vmem:[#allocation4 + $0xf8] sm:$0xff] }
 0x15f   :  { %v2548_v53 = vpack.c.bf16 %v442_v47, %v442_v47 }
 0x160   :  { %939 = vmatpush2.bf16.msra.mxu0 %v770_v49  ;;  %980 = vmatpush2.bf16.msra.mxu1 %v834_v50  ;;  %v468_v49 = vld [vmem:[#allocation4 + $0x70] sm:$0xff]  ;;  %v677_v50 = vunpack.c.h.s8.bf16 %v501_v43 }
 0x161   :  { %940 = vmatprep.subr.bf16.mxu0 %v767_v51  ;;  %981 = vmatprep.subr.bf16.mxu1 %v831_v52  ;;  %v2546_v51 = vpack.c.bf16 %v444_v44, %v444_v44  ;;  %v612_v52 = vunpack.c.h.s8.bf16 %v468_v49 }
 0x164   :  { %941 = vmatpush2.bf16.msra.mxu0 %v766_v55  ;;  %982 = vmatpush2.bf16.msra.mxu1 %v830_v56  ;;  %v609_v55 = vunpack.c.l.s8.bf16 %v469_v42  ;;  %v465_v56 = vld [vmem:[#allocation4 + $0x58] sm:$0xff]  ;;  %v645_v42 = vunpack.c.h.s8.bf16 %v485_v36 }
 0x165   :  { %942 = vmatprep.subr.bf16.mxu0 %v763_v57  ;;  %983 = vmatprep.subr.bf16.mxu1 %v827_v59  ;;  %v673_v57 = vunpack.c.l.s8.bf16 %v501_v43  ;;  %v608_v59 = vunpack.c.l.s8.bf16 %v468_v49  ;;  %v484_v43 = vld [vmem:[#allocation4 + $0xf0] sm:$0xff] }
 0x166   :  { %v644_v47 = vunpack.c.h.s8.bf16 %v484_v43 }
 0x168   :  { %943 = vmatpush2.bf16.msra.mxu0 %v762_v61  ;;  %984 = vmatpush2.bf16.msra.mxu1 %v826_v62  ;;  %v605_v61 = vunpack.c.h.s8.bf16 %v465_v56  ;;  %v464_v62 = vld [vmem:[#allocation4 + $0x50] sm:$0xff] }
 0x169   :  { %944 = vmatprep.subr.bf16.mxu0 %v759_v0  ;;  %985 = vmatprep.subr.bf16.mxu1 %v823_v1  ;;  %v669_v0 = vunpack.c.h.s8.bf16 %v497_v58  ;;  %v496_v1 = vld [vmem:[#allocation4 + $0x150] sm:$0xff]  ;;  %v604_v2 = vunpack.c.h.s8.bf16 %v464_v62  ;;  %v600_v14 = vunpack.c.l.s8.bf16 %v464_v62  ;;  %v697_v62 = vunpack.c.l.s8.bf16 %v513_v41 }
 0x16a   :  { %v668_v10 = vunpack.c.h.s8.bf16 %v496_v1 }
 0x16c   :  { %945 = vmatpush2.bf16.msra.mxu0 %v758_v11  ;;  %986 = vmatpush2.bf16.msra.mxu1 %v822_v12  ;;  %v601_v11 = vunpack.c.l.s8.bf16 %v465_v56  ;;  %v665_v12 = vunpack.c.l.s8.bf16 %v497_v58  ;;  %v480_v56 = vld [vmem:[#allocation4 + $0xd0] sm:$0xff] }
 0x16d   :  { %946 = vmatprep.subr.bf16.mxu0 %v755_v13  ;;  %987 = vmatprep.subr.bf16.mxu1 %v819_v15  ;;  %v461_v13 = vld [vmem:[#allocation4 + $0x38] sm:$0xff]  ;;  %v664_v15 = vunpack.c.l.s8.bf16 %v496_v1  ;;  %v512_v58 = vld [vmem:[#allocation4 + $0x1d0] sm:$0xff] }
 0x16e   :  { %v509_v1 = vld [vmem:[#allocation4 + $0x1b8] sm:$0xff] }
 0x16f   :  { %v689_v16 = vunpack.c.l.s8.bf16 %v509_v1 }
 0x170   :  { %947 = vmatpush2.bf16.msra.mxu0 %v754_v17  ;;  %988 = vmatpush2.bf16.msra.mxu1 %v818_v20  ;;  %v660_v20 = vunpack.c.h.s8.bf16 %v492_v18 }
 0x171   :  { %948 = vmatprep.subr.bf16.mxu0 %v751_v21  ;;  %989 = vmatprep.subr.bf16.mxu1 %v815_v22  ;;  %v593_v21 = vunpack.c.l.s8.bf16 %v461_v13 }
 0x174   :  { %949 = vmatpush2.bf16.msra.mxu0 %v750_v26  ;;  %990 = vmatpush2.bf16.msra.mxu1 %v814_v28  ;;  %v656_v26 = vunpack.c.l.s8.bf16 %v492_v18  ;;  %v456_v28 = vld [vmem:[#allocation4 + $0x10] sm:$0xff]  ;;  %v505_v18 = vld [vmem:[#allocation4 + $0x198] sm:$0xff] }
 0x175   :  { %950 = vmatprep.subr.bf16.mxu0 %v747_v29  ;;  %991 = vmatprep.subr.bf16.mxu1 %v811_v31  ;;  %v653_v29 = vunpack.c.h.s8.bf16 %v489_v24  ;;  %v588_v31 = vunpack.c.h.s8.bf16 %v456_v28  ;;  %v685_v23 = vunpack.c.h.s8.bf16 %v505_v18 }
 0x178   :  { %951 = vmatpush2.bf16.msra.mxu0 %v746_v35  ;;  %992 = vmatpush2.bf16.msra.mxu1 %v810_v37  ;;  %v649_v35 = vunpack.c.l.s8.bf16 %v489_v24  ;;  %v517_v37 = vld [vmem:[#allocation4 + $0x1f8] sm:$0xff]  ;;  %v504_v24 = vld [vmem:[#allocation4 + $0x190] sm:$0xff] }
 0x179   :  { %952 = vmatprep.subr.bf16.mxu0 %v743_v40  ;;  %993 = vmatprep.subr.bf16.mxu1 %v807_v5  ;;  %v584_v40 = vunpack.c.l.s8.bf16 %v456_v28  ;;  %v648_v5 = vunpack.c.l.s8.bf16 %v488_v30  ;;  %v709_v44 = vunpack.c.h.s8.bf16 %v517_v37  ;;  %v705_v49 = vunpack.c.l.s8.bf16 %v517_v37  ;;  %v565_v30 = vld [vmem:[#allocation4 + $0x378] sm:$0xff]  ;;  %v564_v37 = vld [vmem:[#allocation4 + $0x370] sm:$0xff] }
 0x17a   :  { %v681_v28 = vunpack.c.l.s8.bf16 %v505_v18 }
 0x17c   :  { %953 = vmatpush2.bf16.msra.mxu0 %v742_v46  ;;  %994 = vmatpush2.bf16.msra.mxu1 %v806_v48  ;;  %v516_v46 = vld [vmem:[#allocation4 + $0x1f0] sm:$0xff] }
 0x17d   :  { %1004 = vmatprep.subr.bf16.mxu0 %v613_v45  ;;  %1045 = vmatprep.subr.bf16.mxu1 %v677_v50  ;;  %v708_v48 = vunpack.c.h.s8.bf16 %v516_v46  ;;  %v641_v45 = vunpack.c.l.s8.bf16 %v485_v36  ;;  %v481_v50 = vld [vmem:[#allocation4 + $0xd8] sm:$0xff]  ;;  %v805_v36 = vunpack.c.h.s8.bf16 %v565_v30 }
 0x17f   :  { %955 = vmatmul.mubr.bf16.vlgmr.msra.gmra.mxu0 %v2548_v53  ;;  %996 = vmatmul.mubr.bf16.vlgmr.msra.gmra.mxu1 %v2546_v51 }
 0x180   :  { %1005 = vmatpush1.bf16.msra.mxu0 %v612_v52  ;;  %1036 = vmatprep.mubr.bf16.mxu0 %v2517_v34  ;;  %v493_v34 = vld [vmem:[#allocation4 + $0x138] sm:$0xff]  ;;  %v640_v52 = vunpack.c.l.s8.bf16 %v484_v43 }
 0x181   :  { %1046 = vmatpush1.bf16.msra.mxu1 %v676_v54  ;;  %1077 = vmatprep.mubr.bf16.mxu1 %v2522_v39  ;;  %v597_v39 = vunpack.c.h.s8.bf16 %v461_v13  ;;  %v661_v17 = vunpack.c.h.s8.bf16 %v493_v34  ;;  %v657_v22 = vunpack.c.l.s8.bf16 %v493_v34  ;;  %v704_v54 = vunpack.c.l.s8.bf16 %v516_v46  ;;  %v508_v34 = vld [vmem:[#allocation4 + $0x1b0] sm:$0xff]  ;;  %v529_v43 = vld [vmem:[#allocation4 + $0x258] sm:$0xff] }
 0x182   :  { %1006 = vmatprep.subr.bf16.mxu0 %v609_v55  ;;  %1047 = vmatprep.subr.bf16.mxu1 %v673_v57  ;;  %v637_v55 = vunpack.c.h.s8.bf16 %v481_v50  ;;  %v701_v57 = vunpack.c.h.s8.bf16 %v513_v41  ;;  %v693_v13 = vunpack.c.h.s8.bf16 %v509_v1  ;;  %v561_v46 = vld [vmem:[#allocation4 + $0x358] sm:$0xff]  ;;  %v560_v41 = vld [vmem:[#allocation4 + $0x350] sm:$0xff] }
 0x184   :  { %1007 = vmatpush1.bf16.msra.mxu0 %v608_v59  ;;  %v636_v59 = vunpack.c.h.s8.bf16 %v480_v56 }
 0x185   :  { %1048 = vmatpush1.bf16.msra.mxu1 %v672_v60  ;;  %1008 = vmatprep.subr.bf16.mxu0 %v605_v61  ;;  %v700_v60 = vunpack.c.h.s8.bf16 %v512_v58  ;;  %v633_v61 = vunpack.c.l.s8.bf16 %v481_v50  ;;  %v797_v50 = vunpack.c.h.s8.bf16 %v561_v46 }
 0x186   :  { %1049 = vmatprep.subr.bf16.mxu1 %v669_v0  ;;  %v477_v0 = vld [vmem:[#allocation4 + $0xb8] sm:$0xff] }
 0x188   :  { %1009 = vmatpush1.bf16.msra.mxu0 %v604_v2  ;;  %v632_v2 = vunpack.c.l.s8.bf16 %v480_v56 }
 0x189   :  { %1050 = vmatpush1.bf16.msra.mxu1 %v668_v10  ;;  %1010 = vmatprep.subr.bf16.mxu0 %v601_v11  ;;  %v696_v10 = vunpack.c.l.s8.bf16 %v512_v58  ;;  %v629_v11 = vunpack.c.h.s8.bf16 %v477_v0  ;;  %v524_v58 = vld [vmem:[#allocation4 + $0x230] sm:$0xff] }
 0x18a   :  { %1051 = vmatprep.subr.bf16.mxu1 %v665_v12  ;;  %v476_v12 = vld [vmem:[#allocation4 + $0xb0] sm:$0xff] }
 0x18c   :  { %1011 = vmatpush1.bf16.msra.mxu0 %v600_v14  ;;  %v628_v14 = vunpack.c.h.s8.bf16 %v476_v12 }
 0x18d   :  { %1052 = vmatpush1.bf16.msra.mxu1 %v664_v15  ;;  %1012 = vmatprep.subr.bf16.mxu0 %v597_v39  ;;  %v692_v15 = vunpack.c.h.s8.bf16 %v508_v34  ;;  %v625_v39 = vunpack.c.l.s8.bf16 %v477_v0 }
 0x18e   :  { %1053 = vmatprep.subr.bf16.mxu1 %v661_v17  ;;  %v473_v17 = vld [vmem:[#allocation4 + $0x98] sm:$0xff] }
 0x190   :  { %1013 = vmatpush1.bf16.msra.mxu0 %v596_v19  ;;  %v624_v19 = vunpack.c.l.s8.bf16 %v476_v12 }
 0x191   :  { %1054 = vmatpush1.bf16.msra.mxu1 %v660_v20  ;;  %1014 = vmatprep.subr.bf16.mxu0 %v593_v21  ;;  %v688_v20 = vunpack.c.l.s8.bf16 %v508_v34  ;;  %v621_v21 = vunpack.c.h.s8.bf16 %v473_v17  ;;  %v520_v34 = vld [vmem:[#allocation4 + $0x210] sm:$0xff] }
 0x192   :  { %1055 = vmatprep.subr.bf16.mxu1 %v657_v22  ;;  %v472_v22 = vld [vmem:[#allocation4 + $0x90] sm:$0xff] }
 0x194   :  { %1015 = vmatpush1.bf16.msra.mxu0 %v592_v25  ;;  %v620_v25 = vunpack.c.h.s8.bf16 %v472_v22 }
 0x195   :  { %1056 = vmatpush1.bf16.msra.mxu1 %v656_v26  ;;  %1016 = vmatprep.subr.bf16.mxu0 %v589_v27  ;;  %v684_v26 = vunpack.c.h.s8.bf16 %v504_v24  ;;  %v617_v27 = vunpack.c.l.s8.bf16 %v473_v17 }
 0x196   :  { %1057 = vmatprep.subr.bf16.mxu1 %v653_v29  ;;  %v533_v29 = vld [vmem:[#allocation4 + $0x278] sm:$0xff] }
 0x198   :  { %1017 = vmatpush1.bf16.msra.mxu0 %v588_v31  ;;  %v616_v31 = vunpack.c.l.s8.bf16 %v472_v22 }
 0x199   :  { %1058 = vmatpush1.bf16.msra.mxu1 %v652_v3  ;;  %1018 = vmatprep.subr.bf16.mxu0 %v585_v32  ;;  %v680_v3 = vunpack.c.l.s8.bf16 %v504_v24  ;;  %v741_v32 = vunpack.c.h.s8.bf16 %v533_v29  ;;  %v548_v24 = vld [vmem:[#allocation4 + $0x2f0] sm:$0xff] }
 0x19a   :  { %1059 = vmatprep.subr.bf16.mxu1 %v649_v35  ;;  %v532_v35 = vld [vmem:[#allocation4 + $0x270] sm:$0xff] }
 0x19c   :  { %1019 = vmatpush1.bf16.msra.mxu0 %v584_v40  ;;  %v740_v40 = vunpack.c.h.s8.bf16 %v532_v35 }
 0x19d   :  { %1060 = vmatpush1.bf16.msra.mxu1 %v648_v5  ;;  %1020 = vmatprep.subr.bf16.mxu0 %v645_v42  ;;  %v804_v5 = vunpack.c.h.s8.bf16 %v564_v37  ;;  %v737_v42 = vunpack.c.l.s8.bf16 %v533_v29 }
 0x19e   :  { %1061 = vmatprep.subr.bf16.mxu1 %v709_v44  ;;  %v801_v44 = vunpack.c.l.s8.bf16 %v565_v30 }
 0x1a0   :  { %1021 = vmatpush2.bf16.msra.mxu0 %v644_v47  ;;  %v736_v47 = vunpack.c.l.s8.bf16 %v532_v35 }
 0x1a1   :  { %1062 = vmatpush2.bf16.msra.mxu1 %v708_v48  ;;  %1022 = vmatprep.subr.bf16.mxu0 %v641_v45  ;;  %v800_v48 = vunpack.c.l.s8.bf16 %v564_v37  ;;  %v733_v45 = vunpack.c.h.s8.bf16 %v529_v43  ;;  %v544_v37 = vld [vmem:[#allocation4 + $0x2d0] sm:$0xff] }
 0x1a2   :  { %1063 = vmatprep.subr.bf16.mxu1 %v705_v49  ;;  %v528_v49 = vld [vmem:[#allocation4 + $0x250] sm:$0xff] }
 0x1a3   :  { %v728_v56 = vunpack.c.l.s8.bf16 %v528_v49 }
 0x1a4   :  { %1023 = vmatpush2.bf16.msra.mxu0 %v640_v52  ;;  %v796_v52 = vunpack.c.h.s8.bf16 %v560_v41 }
 0x1a5   :  { %1064 = vmatpush2.bf16.msra.mxu1 %v704_v54  ;;  %1024 = vmatprep.subr.bf16.mxu0 %v637_v55  ;;  %v793_v54 = vunpack.c.l.s8.bf16 %v561_v46  ;;  %v525_v55 = vld [vmem:[#allocation4 + $0x238] sm:$0xff] }
 0x1a6   :  { %1065 = vmatprep.subr.bf16.mxu1 %v701_v57  ;;  %v792_v57 = vunpack.c.l.s8.bf16 %v560_v41  ;;  %v721_v0 = vunpack.c.l.s8.bf16 %v525_v55  ;;  %v540_v41 = vld [vmem:[#allocation4 + $0x2b0] sm:$0xff] }
 0x1a8   :  { %1025 = vmatpush2.bf16.msra.mxu0 %v636_v59 }
 0x1a9   :  { %1066 = vmatpush2.bf16.msra.mxu1 %v700_v60  ;;  %1026 = vmatprep.subr.bf16.mxu0 %v633_v61  ;;  %v556_v60 = vld [vmem:[#allocation4 + $0x330] sm:$0xff]  ;;  %v724_v61 = vunpack.c.h.s8.bf16 %v524_v58 }
 0x1aa   :  { %1067 = vmatprep.subr.bf16.mxu1 %v697_v62  ;;  %v788_v62 = vunpack.c.h.s8.bf16 %v556_v60  ;;  %v784_v12 = vunpack.c.l.s8.bf16 %v556_v60  ;;  %v536_v60 = vld [vmem:[#allocation4 + $0x290] sm:$0xff] }
 0x1ac   :  { %1027 = vmatpush2.bf16.msra.mxu0 %v632_v2  ;;  %v521_v2 = vld [vmem:[#allocation4 + $0x218] sm:$0xff] }
 0x1ad   :  { %1068 = vmatpush2.bf16.msra.mxu1 %v696_v10  ;;  %1028 = vmatprep.subr.bf16.mxu0 %v629_v11  ;;  %v553_v10 = vld [vmem:[#allocation4 + $0x318] sm:$0xff]  ;;  %v720_v11 = vunpack.c.l.s8.bf16 %v524_v58  ;;  %v713_v17 = vunpack.c.l.s8.bf16 %v521_v2 }
 0x1ae   :  { %1069 = vmatprep.subr.bf16.mxu1 %v693_v13  ;;  %v717_v13 = vunpack.c.h.s8.bf16 %v521_v2  ;;  %v777_v18 = vunpack.c.l.s8.bf16 %v553_v10 }
 0x1b0   :  { %1029 = vmatpush2.bf16.msra.mxu0 %v628_v14  ;;  %v781_v14 = vunpack.c.h.s8.bf16 %v553_v10 }
 0x1b1   :  { %1070 = vmatpush2.bf16.msra.mxu1 %v692_v15  ;;  %1030 = vmatprep.subr.bf16.mxu0 %v625_v39  ;;  %v552_v15 = vld [vmem:[#allocation4 + $0x310] sm:$0xff]  ;;  %v716_v39 = vunpack.c.h.s8.bf16 %v520_v34 }
 0x1b2   :  { %1071 = vmatprep.subr.bf16.mxu1 %v689_v16  ;;  %v780_v16 = vunpack.c.h.s8.bf16 %v552_v15  ;;  %v776_v22 = vunpack.c.l.s8.bf16 %v552_v15 }
 0x1b4   :  { %1031 = vmatpush2.bf16.msra.mxu0 %v624_v19  ;;  %v549_v19 = vld [vmem:[#allocation4 + $0x2f8] sm:$0xff] }
 0x1b5   :  { %1072 = vmatpush2.bf16.msra.mxu1 %v688_v20  ;;  %1032 = vmatprep.subr.bf16.mxu0 %v621_v21  ;;  %v581_v20 = vld [vmem:[#allocation4 + $0x3f8] sm:$0xff]  ;;  %v712_v21 = vunpack.c.l.s8.bf16 %v520_v34  ;;  %v769_v29 = vunpack.c.l.s8.bf16 %v549_v19 }
 0x1b6   :  { %1073 = vmatprep.subr.bf16.mxu1 %v685_v23  ;;  %v773_v23 = vunpack.c.h.s8.bf16 %v549_v19  ;;  %v833_v30 = vunpack.c.l.s8.bf16 %v581_v20 }
 0x1b8   :  { %1033 = vmatpush2.bf16.msra.mxu0 %v620_v25  ;;  %v837_v25 = vunpack.c.h.s8.bf16 %v581_v20 }
 0x1b9   :  { %1074 = vmatpush2.bf16.msra.mxu1 %v684_v26  ;;  %1034 = vmatprep.subr.bf16.mxu0 %v617_v27  ;;  %v580_v26 = vld [vmem:[#allocation4 + $0x3f0] sm:$0xff]  ;;  %v772_v27 = vunpack.c.h.s8.bf16 %v548_v24 }
 0x1ba   :  { %1075 = vmatprep.subr.bf16.mxu1 %v681_v28  ;;  %v836_v28 = vunpack.c.h.s8.bf16 %v580_v26  ;;  %v832_v35 = vunpack.c.l.s8.bf16 %v580_v26 }
 0x1bc   :  { %1035 = vmatpush2.bf16.msra.mxu0 %v616_v31  ;;  %v545_v31 = vld [vmem:[#allocation4 + $0x2d8] sm:$0xff] }
 0x1bd   :  { %1076 = vmatpush2.bf16.msra.mxu1 %v680_v3  ;;  %1086 = vmatprep.subr.bf16.mxu0 %v741_v32  ;;  %v577_v3 = vld [vmem:[#allocation4 + $0x3d8] sm:$0xff]  ;;  %v768_v32 = vunpack.c.l.s8.bf16 %v548_v24 }
 0x1be   :  { %1127 = vmatprep.subr.bf16.mxu1 %v805_v36  ;;  %v765_v36 = vunpack.c.h.s8.bf16 %v545_v31  ;;  %v825_v46 = vunpack.c.l.s8.bf16 %v577_v3 }
 0x1bf   :  { %1037 = vmatmul.mubr.bf16.vlgmr.msra.gmra.mxu0 %v2520_v38  ;;  %v732_v38 = vunpack.c.h.s8.bf16 %v528_v49 }
 0x1c0   :  { %1078 = vmatmul.mubr.bf16.vlgmr.msra.gmra.mxu1 %v2515_v33  ;;  %1087 = vmatpush1.bf16.msra.mxu0 %v740_v40  ;;  %v729_v33 = vunpack.c.l.s8.bf16 %v529_v43  ;;  %v829_v40 = vunpack.c.h.s8.bf16 %v577_v3 }
 0x1c1   :  { %1118 = vmatprep.mubr.bf16.mxu0 %v2534_v63  ;;  %1128 = vmatpush1.bf16.msra.mxu1 %v804_v5  ;;  %v557_v63 = vld [vmem:[#allocation4 + $0x338] sm:$0xff]  ;;  %v576_v5 = vld [vmem:[#allocation4 + $0x3d0] sm:$0xff] }
 0x1c2   :  { %1159 = vmatprep.mubr.bf16.mxu1 %v2536_v9  ;;  %1088 = vmatprep.subr.bf16.mxu0 %v737_v42  ;;  %v725_v9 = vunpack.c.h.s8.bf16 %v525_v55  ;;  %v789_v59 = vunpack.c.h.s8.bf16 %v557_v63  ;;  %v785_v1 = vunpack.c.l.s8.bf16 %v557_v63  ;;  %v764_v42 = vunpack.c.h.s8.bf16 %v544_v37 }
 0x1c3   :  { %1129 = vmatprep.subr.bf16.mxu1 %v801_v44  ;;  %v828_v43 = vunpack.c.h.s8.bf16 %v576_v5  ;;  %v761_v44 = vunpack.c.l.s8.bf16 %v545_v31  ;;  %v824_v49 = vunpack.c.l.s8.bf16 %v576_v5  ;;  %v1248_v31 = vld [vmem:[%s2826_s6 + $0xb0] sm:$0xff] }
 0x1c4   :  { %1089 = vmatpush1.bf16.msra.mxu0 %v736_v47  ;;  %v541_v47 = vld [vmem:[#allocation4 + $0x2b8] sm:$0xff]  ;;  %v1228_v5 = vld [vmem:[%s2826_s6 + $0x10] sm:$0xff] }
 0x1c5   :  { %1130 = vmatpush1.bf16.msra.mxu1 %v800_v48  ;;  %1090 = vmatprep.subr.bf16.mxu0 %v733_v45  ;;  %v573_v48 = vld [vmem:[#allocation4 + $0x3b8] sm:$0xff]  ;;  %v760_v45 = vunpack.c.l.s8.bf16 %v544_v37  ;;  %v753_v55 = vunpack.c.l.s8.bf16 %v541_v47  ;;  %v1247_v37 = vld [vmem:[%s2826_s6 + $0xa8] sm:$0xff] }
 0x1c6   :  { %1131 = vmatprep.subr.bf16.mxu1 %v797_v50  ;;  %v757_v50 = vunpack.c.h.s8.bf16 %v541_v47  ;;  %v817_v63 = vunpack.c.l.s8.bf16 %v573_v48 }
 0x1c8   :  { %1091 = vmatpush1.bf16.msra.mxu0 %v732_v38  ;;  %v821_v38 = vunpack.c.h.s8.bf16 %v573_v48  ;;  %v1227_v48 = vld [vmem:[%s2826_s6 + $0x8] sm:$0xff] }
 0x1c9   :  { %1132 = vmatpush1.bf16.msra.mxu1 %v796_v52  ;;  %1092 = vmatprep.subr.bf16.mxu0 %v729_v33  ;;  %v572_v52 = vld [vmem:[#allocation4 + $0x3b0] sm:$0xff]  ;;  %v756_v33 = vunpack.c.h.s8.bf16 %v540_v41 }
 0x1ca   :  { %1133 = vmatprep.subr.bf16.mxu1 %v793_v54  ;;  %v820_v54 = vunpack.c.h.s8.bf16 %v572_v52  ;;  %v816_v58 = vunpack.c.l.s8.bf16 %v572_v52  ;;  %v1226_v52 = vld [vmem:[%s2826_s6] sm:$0xff] }
 0x1cc   :  { %1093 = vmatpush1.bf16.msra.mxu0 %v728_v56  ;;  %v537_v56 = vld [vmem:[#allocation4 + $0x298] sm:$0xff] }
 0x1cd   :  { %1134 = vmatpush1.bf16.msra.mxu1 %v792_v57  ;;  %1094 = vmatprep.subr.bf16.mxu0 %v725_v9  ;;  %v569_v57 = vld [vmem:[#allocation4 + $0x398] sm:$0xff]  ;;  %v752_v9 = vunpack.c.l.s8.bf16 %v540_v41  ;;  %v745_v2 = vunpack.c.l.s8.bf16 %v537_v56 }
 0x1ce   :  { %1135 = vmatprep.subr.bf16.mxu1 %v789_v59  ;;  %v749_v59 = vunpack.c.h.s8.bf16 %v537_v56  ;;  %v809_v10 = vunpack.c.l.s8.bf16 %v569_v57  ;;  %v1245_v41 = vld [vmem:[%s2826_s6 + $0x98] sm:$0xff]  ;;  %v1259_v56 = vunpack.c.l.s8.bf16 %v1227_v48 }
 0x1d0   :  { %1095 = vmatpush1.bf16.msra.mxu0 %v724_v61  ;;  %v813_v61 = vunpack.c.h.s8.bf16 %v569_v57  ;;  %v1241_v57 = vld [vmem:[%s2826_s6 + $0x78] sm:$0xff] }
 0x1d1   :  { %1136 = vmatpush1.bf16.msra.mxu1 %v788_v62  ;;  %1096 = vmatprep.subr.bf16.mxu0 %v721_v0  ;;  %v568_v62 = vld [vmem:[#allocation4 + $0x390] sm:$0xff]  ;;  %v748_v0 = vunpack.c.h.s8.bf16 %v536_v60 }
 0x1d2   :  { %1137 = vmatprep.subr.bf16.mxu1 %v785_v1  ;;  %v812_v1 = vunpack.c.h.s8.bf16 %v568_v62 }
 0x1d4   :  { %1097 = vmatpush1.bf16.msra.mxu0 %v720_v11  ;;  %v1233_v11 = vld [vmem:[%s2826_s6 + $0x38] sm:$0xff] }
 0x1d5   :  { %1138 = vmatpush1.bf16.msra.mxu1 %v784_v12  ;;  %1098 = vmatprep.subr.bf16.mxu0 %v717_v13  ;;  %v744_v12 = vunpack.c.l.s8.bf16 %v536_v60  ;;  %v808_v13 = vunpack.c.l.s8.bf16 %v568_v62  ;;  %v1273_v34 = vunpack.c.h.s8.bf16 %v1233_v11  ;;  %v1243_v60 = vld [vmem:[%s2826_s6 + $0x88] sm:$0xff]  ;;  %v1240_v62 = vld [vmem:[%s2826_s6 + $0x70] sm:$0xff] }
 0x1d6   :  { %1139 = vmatprep.subr.bf16.mxu1 %v781_v14  ;;  %v1232_v14 = vld [vmem:[%s2826_s6 + $0x30] sm:$0xff] }
 0x1d7   :  { %v1272_v15 = vunpack.c.h.s8.bf16 %v1232_v14  ;;  %v1270_v19 = vunpack.c.l.s8.bf16 %v1232_v14  ;;  %v1286_v14 = vunpack.c.l.s8.bf16 %v1240_v62 }
 0x1d8   :  { %1099 = vmatpush1.bf16.msra.mxu0 %v716_v39  ;;  %v1271_v39 = vunpack.c.l.s8.bf16 %v1233_v11  ;;  %v1287_v11 = vunpack.c.l.s8.bf16 %v1241_v57 }
 0x1d9   :  { %1140 = vmatpush1.bf16.msra.mxu1 %v780_v16  ;;  %1100 = vmatprep.subr.bf16.mxu0 %v713_v17  ;;  %v1231_v16 = vld [vmem:[%s2826_s6 + $0x28] sm:$0xff] }
 0x1da   :  { %1141 = vmatprep.subr.bf16.mxu1 %v777_v18 }
 0x1dc   :  { %1101 = vmatpush1.bf16.msra.mxu0 %v712_v21 }
 0x1dd   :  { %1142 = vmatpush1.bf16.msra.mxu1 %v776_v22  ;;  %1102 = vmatprep.subr.bf16.mxu0 %v773_v23  ;;  %v1269_v22 = vunpack.c.h.s8.bf16 %v1231_v16  ;;  %v1230_v23 = vld [vmem:[%s2826_s6 + $0x20] sm:$0xff] }
 0x1de   :  { %1143 = vmatprep.subr.bf16.mxu1 %v837_v25  ;;  %v1268_v26 = vunpack.c.h.s8.bf16 %v1230_v23 }
 0x1e0   :  { %1103 = vmatpush2.bf16.msra.mxu0 %v772_v27  ;;  %v1267_v27 = vunpack.c.l.s8.bf16 %v1231_v16  ;;  %v1238_v16 = vld [vmem:[%s2826_s6 + $0x60] sm:$0xff] }
 0x1e1   :  { %1144 = vmatpush2.bf16.msra.mxu1 %v836_v28  ;;  %1104 = vmatprep.subr.bf16.mxu0 %v769_v29  ;;  %v1229_v29 = vld [vmem:[%s2826_s6 + $0x18] sm:$0xff] }
 0x1e2   :  { %1145 = vmatprep.subr.bf16.mxu1 %v833_v30  ;;  %v1249_v30 = vld [vmem:[%s2826_s6 + $0xb8] sm:$0xff]  ;;  %v1263_v47 = vunpack.c.l.s8.bf16 %v1229_v29 }
 0x1e3   :  { %v1305_v3 = vunpack.c.h.s8.bf16 %v1249_v30 }
 0x1e4   :  { %1105 = vmatpush2.bf16.msra.mxu0 %v768_v32  ;;  %v1304_v32 = vunpack.c.h.s8.bf16 %v1248_v31 }
 0x1e5   :  { %1146 = vmatpush2.bf16.msra.mxu1 %v832_v35  ;;  %1106 = vmatprep.subr.bf16.mxu0 %v765_v36  ;;  %v1303_v35 = vunpack.c.l.s8.bf16 %v1249_v30  ;;  %v1266_v36 = vunpack.c.l.s8.bf16 %v1230_v23 }
 0x1e6   :  { %1147 = vmatprep.subr.bf16.mxu1 %v829_v40  ;;  %v1265_v40 = vunpack.c.h.s8.bf16 %v1229_v29  ;;  %v1236_v29 = vld [vmem:[%s2826_s6 + $0x50] sm:$0xff] }
 0x1e8   :  { %1107 = vmatpush2.bf16.msra.mxu0 %v764_v42  ;;  %v1302_v42 = vunpack.c.l.s8.bf16 %v1248_v31 }
 0x1e9   :  { %1148 = vmatpush2.bf16.msra.mxu1 %v828_v43  ;;  %1108 = vmatprep.subr.bf16.mxu0 %v761_v44  ;;  %v1301_v43 = vunpack.c.h.s8.bf16 %v1247_v37  ;;  %v1246_v44 = vld [vmem:[%s2826_s6 + $0xa0] sm:$0xff] }
 0x1ea   :  { %1149 = vmatprep.subr.bf16.mxu1 %v825_v46  ;;  %v1264_v46 = vunpack.c.h.s8.bf16 %v1228_v5 }
 0x1ec   :  { %1109 = vmatpush2.bf16.msra.mxu0 %v760_v45  ;;  %v1300_v45 = vunpack.c.h.s8.bf16 %v1246_v44 }
 0x1ed   :  { %1150 = vmatpush2.bf16.msra.mxu1 %v824_v49  ;;  %1110 = vmatprep.subr.bf16.mxu0 %v757_v50  ;;  %v1299_v49 = vunpack.c.l.s8.bf16 %v1247_v37  ;;  %v1262_v50 = vunpack.c.l.s8.bf16 %v1228_v5  ;;  %v1278_v5 = vunpack.c.l.s8.bf16 %v1236_v29 }
 0x1ee   :  { %1151 = vmatprep.subr.bf16.mxu1 %v821_v38  ;;  %v1261_v38 = vunpack.c.h.s8.bf16 %v1227_v48 }
 0x1f0   :  { %1111 = vmatpush2.bf16.msra.mxu0 %v756_v33  ;;  %v1298_v33 = vunpack.c.l.s8.bf16 %v1246_v44 }
 0x1f1   :  { %1152 = vmatpush2.bf16.msra.mxu1 %v820_v54  ;;  %1112 = vmatprep.subr.bf16.mxu0 %v753_v55  ;;  %v1297_v54 = vunpack.c.h.s8.bf16 %v1245_v41  ;;  %v1244_v55 = vld [vmem:[%s2826_s6 + $0x90] sm:$0xff] }
 0x1f2   :  { %1153 = vmatprep.subr.bf16.mxu1 %v817_v63  ;;  %v1260_v63 = vunpack.c.h.s8.bf16 %v1226_v52 }
 0x1f4   :  { %1113 = vmatpush2.bf16.msra.mxu0 %v752_v9  ;;  %v1296_v9 = vunpack.c.h.s8.bf16 %v1244_v55 }
 0x1f5   :  { %1154 = vmatpush2.bf16.msra.mxu1 %v816_v58  ;;  %1114 = vmatprep.subr.bf16.mxu0 %v749_v59  ;;  %v1295_v58 = vunpack.c.l.s8.bf16 %v1245_v41  ;;  %v1258_v59 = vunpack.c.l.s8.bf16 %v1226_v52  ;;  %v2655_v41 = vld [vmem:[#allocation7] sm:$0xf]  ;;  %v1252_v52 = vld [vmem:[%s2826_s6 + $0xd0] sm:$0xff] }
 0x1f6   :  { %1155 = vmatprep.subr.bf16.mxu1 %v813_v61  ;;  %v1289_v61 = vunpack.c.h.s8.bf16 %v1241_v57 }
 0x1f8   :  { %1115 = vmatpush2.bf16.msra.mxu0 %v748_v0  ;;  %v1294_v0 = vunpack.c.l.s8.bf16 %v1244_v55 }
 0x1f9   :  { %1156 = vmatpush2.bf16.msra.mxu1 %v812_v1  ;;  %1116 = vmatprep.subr.bf16.mxu0 %v745_v2  ;;  %v1293_v1 = vunpack.c.h.s8.bf16 %v1243_v60  ;;  %v1242_v2 = vld [vmem:[%s2826_s6 + $0x80] sm:$0xff] }
 0x1fa   :  { %1157 = vmatprep.subr.bf16.mxu1 %v809_v10  ;;  %v1288_v10 = vunpack.c.h.s8.bf16 %v1240_v62 }
 0x1fc   :  { %1117 = vmatpush2.bf16.msra.mxu0 %v744_v12  ;;  %v1239_v12 = vld [vmem:[%s2826_s6 + $0x68] sm:$0xff] }
 0x1fd   :  { %1158 = vmatpush2.bf16.msra.mxu1 %v808_v13  ;;  %1324 = vmatprep.subr.bf16.mxu0 %v1273_v34  ;;  %v1292_v13 = vunpack.c.h.s8.bf16 %v1242_v2  ;;  %v1291_v34 = vunpack.c.l.s8.bf16 %v1243_v60  ;;  %v1283_v23 = vunpack.c.l.s8.bf16 %v1239_v12 }
 0x1fe   :  { %1365 = vmatprep.subr.bf16.mxu1 %v1305_v3  ;;  %v1254_v3 = vld [vmem:[%s2826_s6 + $0xe0] sm:$0xff] }
 0x1ff   :  { %1119 = vmatmul.mubr.bf16.vlgmr.msra.gmra.mxu0 %v2548_v53  ;;  %v874_v17 = vpop.f32.mrf.mxu0  ;;  %v915_v18 = vpop.f32.mrf.mxu1  ;;  %v1316_v37 = vunpack.c.h.s8.bf16 %v1254_v3  ;;  %v1314_v44 = vunpack.c.l.s8.bf16 %v1254_v3 }
 0x200   :  { %1160 = vmatmul.mubr.bf16.vlgmr.msra.gmra.mxu1 %v2546_v51  ;;  %1325 = vmatpush1.bf16.msra.mxu0 %v1272_v15  ;;  %v2569_v20 = vadd.f32 %v915_v18, %v874_v17  ;;  %v1257_v15 = vld [vmem:[%s2826_s6 + $0xf8] sm:$0xff]  ;;  %v1290_v17 = vunpack.c.l.s8.bf16 %v1242_v2  ;;  %v1310_v2 = vunpack.c.l.s8.bf16 %v1252_v52 }
 0x201   :  { %v2571_v21 = vpop.f32.mrf.mxu0  ;;  %1326 = vmatprep.subr.bf16.mxu0 %v1271_v39  ;;  %v2576_v24 = vpop.f32.mrf.mxu1  ;;  %1366 = vmatpush1.bf16.msra.mxu1 %v1304_v32  ;;  %v1285_v39 = vunpack.c.h.s8.bf16 %v1239_v12  ;;  %v1321_v18 = vunpack.c.h.s8.bf16 %v1257_v15  ;;  %v1280_v32 = vunpack.c.h.s8.bf16 %v1236_v29 }
 0x202   :  { %1367 = vmatprep.subr.bf16.mxu1 %v1303_v35 }
 0x203   :  { %v878_v25 = vpop.f32.mrf.mxu0  ;;  %v919_v53 = vpop.f32.mrf.mxu1 }
 0x204   :  { %1327 = vmatpush1.bf16.msra.mxu0 %v1270_v19  ;;  %v1256_v19 = vld [vmem:[%s2826_s6 + $0xf0] sm:$0xff]  ;;  %v1237_v25 = vld [vmem:[%s2826_s6 + $0x58] sm:$0xff] }
 0x205   :  { %v879_v51 = vpop.f32.mrf.mxu0  ;;  %1328 = vmatprep.subr.bf16.mxu0 %v1269_v22  ;;  %v920_v28 = vpop.f32.mrf.mxu1  ;;  %1368 = vmatpush1.bf16.msra.mxu1 %v1302_v42  ;;  %v1284_v22 = vunpack.c.h.s8.bf16 %v1238_v16  ;;  %v1320_v53 = vunpack.c.h.s8.bf16 %v1256_v19  ;;  %v1318_v30 = vunpack.c.l.s8.bf16 %v1256_v19  ;;  %v1279_v35 = vunpack.c.l.s8.bf16 %v1237_v25 }
 0x206   :  { %1369 = vmatprep.subr.bf16.mxu1 %v1301_v43  ;;  %v1282_v51 = vunpack.c.l.s8.bf16 %v1238_v16  ;;  %v1281_v28 = vunpack.c.h.s8.bf16 %v1237_v25  ;;  %v1234_v43 = vld [vmem:[%s2826_s6 + $0x40] sm:$0xff] }
 0x207   :  { %v1274_v48 = vunpack.c.l.s8.bf16 %v1234_v43 }
 0x208   :  { %1329 = vmatpush1.bf16.msra.mxu0 %v1268_v26  ;;  %v1319_v26 = vunpack.c.l.s8.bf16 %v1257_v15  ;;  %v1250_v15 = vld [vmem:[%s2826_s6 + $0xc0] sm:$0xff] }
 0x209   :  { %1330 = vmatprep.subr.bf16.mxu0 %v1267_v27  ;;  %1370 = vmatpush1.bf16.msra.mxu1 %v1300_v45  ;;  %v1255_v27 = vld [vmem:[%s2826_s6 + $0xe8] sm:$0xff]  ;;  %v2650_v45 = vld [vmem:[#allocation6] sm:$0xf]  ;;  %v1308_v16 = vunpack.c.h.s8.bf16 %v1250_v15 }
 0x20a   :  { %1371 = vmatprep.subr.bf16.mxu1 %v1299_v49  ;;  %v1317_v31 = vunpack.c.h.s8.bf16 %v1255_v27  ;;  %v1253_v49 = vld [vmem:[%s2826_s6 + $0xd8] sm:$0xff] }
 0x20c   :  { %1331 = vmatpush1.bf16.msra.mxu0 %v1266_v36  ;;  %v1235_v36 = vld [vmem:[%s2826_s6 + $0x48] sm:$0xff] }
 0x20d   :  { %1332 = vmatprep.subr.bf16.mxu0 %v1265_v40  ;;  %1372 = vmatpush1.bf16.msra.mxu1 %v1298_v33  ;;  %v1315_v40 = vunpack.c.l.s8.bf16 %v1255_v27  ;;  %v1277_v42 = vunpack.c.h.s8.bf16 %v1235_v36  ;;  %v918_v33 = vadd.f32 %v2576_v24, %v2571_v21  ;;  %v1311_v24 = vunpack.c.l.s8.bf16 %v1253_v49 }
 0x20e   :  { %1373 = vmatprep.subr.bf16.mxu1 %v1297_v54 }
 0x210   :  { %1333 = vmatpush1.bf16.msra.mxu0 %v1264_v46  ;;  %v1276_v46 = vunpack.c.h.s8.bf16 %v1234_v43  ;;  %v1445_v43 = vld [vmem:[#allocation10 + $0x48] sm:$0xff] }
 0x211   :  { %1334 = vmatprep.subr.bf16.mxu0 %v1263_v47  ;;  %1374 = vmatpush1.bf16.msra.mxu1 %v1296_v9  ;;  %v1275_v47 = vunpack.c.l.s8.bf16 %v1235_v36  ;;  %v1448_v36 = vld [vmem:[#allocation10 + $0x60] sm:$0xff] }
 0x212   :  { %1375 = vmatprep.subr.bf16.mxu1 %v1295_v58  ;;  %v1197_v58 = vrot.slane %v2655_v41, %v2489_v4 }
 0x214   :  { %1335 = vmatpush1.bf16.msra.mxu0 %v1262_v50 }
 0x215   :  { %1336 = vmatprep.subr.bf16.mxu0 %v1261_v38  ;;  %1376 = vmatpush1.bf16.msra.mxu1 %v1294_v0  ;;  %v1313_v38 = vunpack.c.h.s8.bf16 %v1253_v49  ;;  %v1201_v0 = vrot.slane %v2655_v41, %v2500_v7  ;;  %v1485_v49 = vunpack.c.l.s8.bf16 %v1445_v43 }
 0x216   :  { %1377 = vmatprep.subr.bf16.mxu1 %v1293_v1 }
 0x218   :  { %1337 = vmatpush1.bf16.msra.mxu0 %v1260_v63  ;;  %v1172_v63 = vrot.slane %v2650_v45, %v2489_v4 }
 0x219   :  { %1338 = vmatprep.subr.bf16.mxu0 %v1259_v56  ;;  %1378 = vmatpush1.bf16.msra.mxu1 %v1292_v13  ;;  %v1312_v56 = vunpack.c.h.s8.bf16 %v1252_v52 }
 0x21a   :  { %1379 = vmatprep.subr.bf16.mxu1 %v1291_v34  ;;  %v1251_v34 = vld [vmem:[%s2826_s6 + $0xc8] sm:$0xff] }
 0x21b   :  { %v1307_v19 = vunpack.c.l.s8.bf16 %v1251_v34 }
 0x21c   :  { %1339 = vmatpush1.bf16.msra.mxu0 %v1258_v59 }
 0x21d   :  { %1340 = vmatprep.subr.bf16.mxu0 %v1289_v61  ;;  %1380 = vmatpush1.bf16.msra.mxu1 %v1290_v17  ;;  %v1176_v61 = vrot.slane %v2650_v45, %v2500_v7 }
 0x21e   :  { %1381 = vmatprep.subr.bf16.mxu1 %v1321_v18 }
 0x220   :  { %1341 = vmatpush2.bf16.msra.mxu0 %v1288_v10 }
 0x221   :  { %1342 = vmatprep.subr.bf16.mxu0 %v1287_v11  ;;  %1382 = vmatpush2.bf16.msra.mxu1 %v1320_v53 }
 0x222   :  { %1383 = vmatprep.subr.bf16.mxu1 %v1319_v26 }
 0x224   :  { %1343 = vmatpush2.bf16.msra.mxu0 %v1286_v14  ;;  %v1309_v14 = vunpack.c.h.s8.bf16 %v1251_v34  ;;  %v2686_v34 = vld [vmem:[#allocation10 + $0xa8] sm:$0xff] }
 0x225   :  { %1344 = vmatprep.subr.bf16.mxu0 %v1285_v39  ;;  %1384 = vmatpush2.bf16.msra.mxu1 %v1318_v30 }
 0x226   :  { %1385 = vmatprep.subr.bf16.mxu1 %v1317_v31 }
 0x228   :  { %1345 = vmatpush2.bf16.msra.mxu0 %v1284_v22  ;;  %v1306_v22 = vunpack.c.l.s8.bf16 %v1250_v15 }
 0x229   :  { %1346 = vmatprep.subr.bf16.mxu0 %v1283_v23  ;;  %1386 = vmatpush2.bf16.msra.mxu1 %v1316_v37 }
 0x22a   :  { %1387 = vmatprep.subr.bf16.mxu1 %v1315_v40 }
 0x22c   :  { %1347 = vmatpush2.bf16.msra.mxu0 %v1282_v51 }
 0x22d   :  { %1348 = vmatprep.subr.bf16.mxu0 %v1281_v28  ;;  %1388 = vmatpush2.bf16.msra.mxu1 %v1314_v44  ;;  %v1492_v44 = vunpack.c.l.s8.bf16 %v1448_v36 }
 0x22e   :  { %1389 = vmatprep.subr.bf16.mxu1 %v1313_v38 }
 0x230   :  { %1349 = vmatpush2.bf16.msra.mxu0 %v1280_v32  ;;  %v1449_v32 = vld [vmem:[#allocation10 + $0x68] sm:$0xff] }
 0x231   :  { %1350 = vmatprep.subr.bf16.mxu0 %v1279_v35  ;;  %1390 = vmatpush2.bf16.msra.mxu1 %v1312_v56  ;;  %v2683_v35 = vld [vmem:[#allocation10 + $0x78] sm:$0xff]  ;;  %v1497_v37 = vunpack.c.h.s8.bf16 %v1449_v32 }
 0x232   :  { %1391 = vmatprep.subr.bf16.mxu1 %v1311_v24  ;;  %v1499_v40 = vunpack.c.h.s8.bf16 %v2683_v35  ;;  %v1464_v24 = vld [vmem:[#allocation10 + $0xe0] sm:$0xff] }
 0x234   :  { %1351 = vmatpush2.bf16.msra.mxu0 %v1278_v5  ;;  %v1496_v5 = vunpack.c.h.s8.bf16 %v1448_v36 }
 0x235   :  { %1352 = vmatprep.subr.bf16.mxu0 %v1277_v42  ;;  %1392 = vmatpush2.bf16.msra.mxu1 %v1310_v2  ;;  %v1493_v42 = vunpack.c.l.s8.bf16 %v1449_v32 }
 0x236   :  { %1393 = vmatprep.subr.bf16.mxu1 %v1309_v14 }
 0x238   :  { %1353 = vmatpush2.bf16.msra.mxu0 %v1276_v46  ;;  %v1489_v46 = vunpack.c.h.s8.bf16 %v1445_v43 }
 0x239   :  { %1354 = vmatprep.subr.bf16.mxu0 %v1275_v47  ;;  %1394 = vmatpush2.bf16.msra.mxu1 %v1308_v16  ;;  %v1444_v47 = vld [vmem:[#allocation10 + $0x40] sm:$0xff]  ;;  %v1180_v16 = vrot.slane %v2650_v45, %v2497_v6 }
 0x23a   :  { %1395 = vmatprep.subr.bf16.mxu1 %v1307_v19  ;;  %v1484_v38 = vunpack.c.l.s8.bf16 %v1444_v47 }
 0x23c   :  { %1355 = vmatpush2.bf16.msra.mxu0 %v1274_v48  ;;  %v1488_v48 = vunpack.c.h.s8.bf16 %v1444_v47 }
 0x23d   :  { %1396 = vmatpush2.bf16.msra.mxu1 %v1306_v22  ;;  %1534 = vmatprep.subr.bf16.mxu0 %v1497_v37 }
 0x23e   :  { %1575 = vmatprep.subr.bf16.mxu1 %v1499_v40 }
 0x23f   :  { %v956_v50 = vpop.f32.mrf.mxu0  ;;  %v997_v55 = vpop.f32.mrf.mxu1 }
 0x240   :  { %v957_v54 = vadd.f32 %v956_v50, %v2569_v20  ;;  %v1441_v50 = vld [vmem:[#allocation10 + $0x28] sm:$0xff] }
 0x241   :  { %v958_v57 = vpop.f32.mrf.mxu0  ;;  %v999_v60 = vpop.f32.mrf.mxu1  ;;  %v1481_v52 = vunpack.c.h.s8.bf16 %v1441_v50 }
 0x242   :  { %v998_v9 = vadd.f32 %v997_v55, %v957_v54  ;;  %v959_v59 = vadd.f32 %v958_v57, %v918_v33  ;;  %v1440_v33 = vld [vmem:[#allocation10 + $0x20] sm:$0xff]  ;;  %v1477_v55 = vunpack.c.l.s8.bf16 %v1441_v50 }
 0x243   :  { %v960_v21 = vpop.f32.mrf.mxu0  ;;  %v1001_v1 = vpop.f32.mrf.mxu1  ;;  %v1480_v54 = vunpack.c.h.s8.bf16 %v1440_v33  ;;  %v1476_v56 = vunpack.c.l.s8.bf16 %v1440_v33 }
 0x244   :  { %v1189_v20 = vmul.f32 %v1172_v63, %v998_v9  ;;  %v1000_v62 = vadd.f32 %v999_v60, %v959_v59  ;;  %v1437_v63 = vld [vmem:[#allocation10 + $0x8] sm:$0xff]  ;;  %v1436_v9 = vld [vmem:[#allocation10] sm:$0xff]  ;;  %v1524_v1 = vunpack.c.l.s8.bf16 %v1464_v24 }
 0x245   :  { %v961_v10 = vpop.f32.mrf.mxu0  ;;  %v1002_v13 = vpop.f32.mrf.mxu1  ;;  %v1473_v57 = vunpack.c.h.s8.bf16 %v1437_v63  ;;  %v1469_v59 = vunpack.c.l.s8.bf16 %v1437_v63  ;;  %v1465_v60 = vld [vmem:[#allocation10 + $0xe8] sm:$0xff] }
 0x246   :  { %v1214_v11 = vadd.f32 %v1197_v58, %v1189_v20  ;;  %v1190_v12 = vmul.f32 %v1176_v61, %v1000_v62  ;;  %v1472_v58 = vunpack.c.h.s8.bf16 %v1436_v9  ;;  %v1468_v61 = vunpack.c.l.s8.bf16 %v1436_v9  ;;  %v1460_v10 = vld [vmem:[#allocation10 + $0xc0] sm:$0xff]  ;;  %v1439_v9 = vld [vmem:[#allocation10 + $0x18] sm:$0xff] }
 0x247   :  { %v1529_v21 = vunpack.c.h.s8.bf16 %v1465_v60  ;;  %v1528_v20 = vunpack.c.h.s8.bf16 %v1464_v24  ;;  %v1525_v62 = vunpack.c.l.s8.bf16 %v1465_v60  ;;  %v1516_v19 = vunpack.c.l.s8.bf16 %v1460_v10  ;;  %v1438_v60 = vld [vmem:[#allocation10 + $0x10] sm:$0xff]  ;;  %v1467_v24 = vld [vmem:[#allocation10 + $0xf8] sm:$0xff] }
 0x248   :  { %v1215_v39 = vadd.f32 %v1201_v0, %v1190_v12  ;;  %v1218_v17 = vmax.f32 %v1214_v11, 0.0  ;;  %v1461_v0 = vld [vmem:[#allocation10 + $0xc8] sm:$0xff]  ;;  %v1520_v11 = vunpack.c.h.s8.bf16 %v1460_v10  ;;  %v1463_v10 = vld [vmem:[#allocation10 + $0xd8] sm:$0xff] }
 0x249   :  { %v1521_v2 = vunpack.c.h.s8.bf16 %v1461_v0  ;;  %v1517_v12 = vunpack.c.l.s8.bf16 %v1461_v0  ;;  %v1466_v0 = vld [vmem:[#allocation10 + $0xf0] sm:$0xff] }
 0x24a   :  { %v1219_v18 = vmax.f32 %v1215_v39, 0.0  ;;  %v1222_v25 = vpack.c.bf16 %v1218_v17, %v1218_v17  ;;  %v1205_v17 = vrot.slane %v2655_v41, %v2497_v6 }
 0x24c   :  { %v1223_v23 = vpack.c.bf16 %v1219_v18, %v1219_v18 }
 0x24e   :  { %1356 = vmatprep.mubr.bf16.mxu0 %v1223_v23 }
 0x24f   :  { %1357 = vmatmul.mubr.bf16.vlgmr.msra.gmra.mxu0 %v1222_v25 }
 0x250   :  { %1535 = vmatpush1.bf16.msra.mxu0 %v1496_v5 }
 0x251   :  { %1536 = vmatprep.subr.bf16.mxu0 %v1493_v42  ;;  %v1450_v42 = vld [vmem:[#allocation10 + $0x70] sm:$0xff] }
 0x254   :  { %1537 = vmatpush1.bf16.msra.mxu0 %v1492_v44 }
 0x255   :  { %1538 = vmatprep.subr.bf16.mxu0 %v1489_v46  ;;  %v1498_v46 = vunpack.c.h.s8.bf16 %v1450_v42 }
 0x258   :  { %1539 = vmatpush1.bf16.msra.mxu0 %v1488_v48  ;;  %v1495_v48 = vunpack.c.l.s8.bf16 %v2683_v35 }
 0x259   :  { %1540 = vmatprep.subr.bf16.mxu0 %v1485_v49  ;;  %v1494_v49 = vunpack.c.l.s8.bf16 %v1450_v42 }
 0x25c   :  { %1541 = vmatpush1.bf16.msra.mxu0 %v1484_v38  ;;  %v1446_v38 = vld [vmem:[#allocation10 + $0x50] sm:$0xff] }
 0x25d   :  { %1542 = vmatprep.subr.bf16.mxu0 %v1481_v52  ;;  %v1490_v52 = vunpack.c.h.s8.bf16 %v1446_v38 }
 0x260   :  { %1543 = vmatpush1.bf16.msra.mxu0 %v1480_v54  ;;  %v1443_v54 = vld [vmem:[#allocation10 + $0x38] sm:$0xff] }
 0x261   :  { %1544 = vmatprep.subr.bf16.mxu0 %v1477_v55  ;;  %v1486_v55 = vunpack.c.l.s8.bf16 %v1446_v38  ;;  %v1483_v63 = vunpack.c.h.s8.bf16 %v1443_v54 }
 0x264   :  { %1545 = vmatpush1.bf16.msra.mxu0 %v1476_v56  ;;  %v1442_v56 = vld [vmem:[#allocation10 + $0x30] sm:$0xff] }
 0x265   :  { %1546 = vmatprep.subr.bf16.mxu0 %v1473_v57  ;;  %v1482_v35 = vunpack.c.h.s8.bf16 %v1442_v56  ;;  %v1479_v57 = vunpack.c.l.s8.bf16 %v1443_v54 }
 0x268   :  { %1547 = vmatpush1.bf16.msra.mxu0 %v1472_v58  ;;  %v1478_v58 = vunpack.c.l.s8.bf16 %v1442_v56 }
 0x269   :  { %1548 = vmatprep.subr.bf16.mxu0 %v1469_v59  ;;  %v1475_v59 = vunpack.c.h.s8.bf16 %v1439_v9 }
 0x26c   :  { %1549 = vmatpush1.bf16.msra.mxu0 %v1468_v61  ;;  %v1474_v61 = vunpack.c.h.s8.bf16 %v1438_v60 }
 0x26d   :  { %1550 = vmatprep.subr.bf16.mxu0 %v1529_v21  ;;  %v1471_v21 = vunpack.c.l.s8.bf16 %v1439_v9 }
 0x270   :  { %1551 = vmatpush2.bf16.msra.mxu0 %v1528_v20  ;;  %v1470_v20 = vunpack.c.l.s8.bf16 %v1438_v60 }
 0x271   :  { %1552 = vmatprep.subr.bf16.mxu0 %v1525_v62  ;;  %v1531_v62 = vunpack.c.h.s8.bf16 %v1467_v24 }
 0x274   :  { %1553 = vmatpush2.bf16.msra.mxu0 %v1524_v1  ;;  %v1530_v1 = vunpack.c.h.s8.bf16 %v1466_v0 }
 0x275   :  { %1554 = vmatprep.subr.bf16.mxu0 %v1521_v2  ;;  %v1527_v2 = vunpack.c.l.s8.bf16 %v1467_v24 }
 0x278   :  { %1555 = vmatpush2.bf16.msra.mxu0 %v1520_v11  ;;  %v1526_v11 = vunpack.c.l.s8.bf16 %v1466_v0  ;;  %v2136_v0 = vld [vmem:[%s2832_s12 + $0x30] sm:$0xff]  }
 0x279   :  { %1556 = vmatprep.subr.bf16.mxu0 %v1517_v12  ;;  %v1523_v12 = vunpack.c.h.s8.bf16 %v1463_v10 }
 0x27c   :  { %1557 = vmatpush2.bf16.msra.mxu0 %v1516_v19 }
 0x27f   :  { %v1038_v53 = vpop.f32.mrf.mxu0 }
 0x280   :  { %v1079_v26 = vpop.f32.mrf.mxu1 }
 0x281   :  { %v2677_v51 = vadd.f32 %v1079_v26, %v1038_v53  ;;  %v2679_v27 = vpop.f32.mrf.mxu0  ;;  %v1184_v53 = vrot.slane %v2650_v45, %v2503_v8  ;;  %v1513_v26 = vunpack.c.h.s8.bf16 %v2686_v34 }
 0x282   :  { %v2681_v28 = vpop.f32.mrf.mxu1 }
 0x283   :  { %v1042_v29 = vpop.f32.mrf.mxu0  ;;  %v1082_v14 = vadd.f32 %v2681_v28, %v2679_v27  ;;  %1558 = vmatprep.subr.bf16.mxu0 %v1513_v26 }
 0x284   :  { %v1083_v30 = vpop.f32.mrf.mxu1 }
 0x285   :  { %v1043_v31 = vpop.f32.mrf.mxu0  ;;  %v1209_v30 = vrot.slane %v2655_v41, %v2503_v8  ;;  %v1447_v41 = vld [vmem:[#allocation10 + $0x58] sm:$0xff] }
 0x286   :  { %v1084_v3 = vpop.f32.mrf.mxu1  ;;  %v1491_v50 = vunpack.c.h.s8.bf16 %v1447_v41  ;;  %v1487_v33 = vunpack.c.l.s8.bf16 %v1447_v41 }
 0x2bf   :  { %v1120_v13 = vpop.f32.mrf.mxu0 }
 0x2c0   :  { %v1121_v15 = vadd.f32 %v1120_v13, %v2677_v51  ;;  %v1161_v39 = vpop.f32.mrf.mxu1  ;;  %v2698_v51 = vld [vmem:[#allocation10 + $0xa0] sm:$0xff]  ;;  %v1462_v13 = vld [vmem:[#allocation10 + $0xd0] sm:$0xff] }
 0x2c1   :  { %v1122_v18 = vpop.f32.mrf.mxu0  ;;  %v1512_v32 = vunpack.c.h.s8.bf16 %v2698_v51  ;;  %v1508_v26 = vunpack.c.l.s8.bf16 %v2698_v51 }
 0x2c2   :  { %v1162_v22 = vadd.f32 %v1161_v39, %v1121_v15  ;;  %v1123_v23 = vadd.f32 %v1122_v18, %v1082_v14  ;;  %v1163_v25 = vpop.f32.mrf.mxu1  ;;  %v1522_v14 = vunpack.c.h.s8.bf16 %v1462_v13  ;;  %v1519_v15 = vunpack.c.l.s8.bf16 %v1463_v10  ;;  %v1459_v39 = vld [vmem:[#allocation10 + $0xb8] sm:$0xff]  ;;  %v1458_v18 = vld [vmem:[#allocation10 + $0xb0] sm:$0xff] }
 0x2c3   :  { %v1124_v27 = vpop.f32.mrf.mxu0  ;;  %1559 = vmatpush2.bf16.msra.mxu0 %v1512_v32  ;;  %v1514_v19 = vunpack.c.h.s8.bf16 %v1458_v18  ;;  %v2139_v10 = vld [vmem:[%s2832_s12 + $0xe8] sm:$0xff]  }
 0x2c4   :  { %v1191_v28 = vmul.f32 %v1180_v16, %v1162_v22  ;;  %v1164_v29 = vadd.f32 %v1163_v25, %v1123_v23  ;;  %v1165_v31 = vpop.f32.mrf.mxu1  ;;  %v1518_v16 = vunpack.c.l.s8.bf16 %v1462_v13  ;;  %v1509_v25 = vunpack.c.l.s8.bf16 %v2686_v34  ;;  %v2142_v13 = vld [vmem:[%s2832_s12 + $0x60] sm:$0xff]  }
 0x2c5   :  { %v1125_v3 = vpop.f32.mrf.mxu0  ;;  %v1510_v27 = vunpack.c.l.s8.bf16 %v1458_v18  ;;  %v2148_v18 = vld [vmem:[%s2832_s12 + $0x18] sm:$0xff]  }
 0x2c6   :  { %v1216_v36 = vadd.f32 %v1205_v17, %v1191_v28  ;;  %v1192_v37 = vmul.f32 %v1184_v53, %v1164_v29  ;;  %v1166_v40 = vpop.f32.mrf.mxu1  ;;  %v1515_v17 = vunpack.c.h.s8.bf16 %v1459_v39  ;;  %v1511_v53 = vunpack.c.l.s8.bf16 %v1459_v39  ;;  %1560 = vmatprep.subr.bf16.mxu0 %v1509_v25  ;;  %v1453_v29 = vld [vmem:[#allocation10 + $0x88] sm:$0xff]  ;;  %v2145_v39 = vld [vmem:[%s2832_s12 + $0xa0] sm:$0xff]  }
 0x2c7   :  { %1561 = vmatpush2.bf16.msra.mxu0 %v1508_v26  ;;  %v1505_v3 = vunpack.c.h.s8.bf16 %v1453_v29  ;;  %v1501_v34 = vunpack.c.l.s8.bf16 %v1453_v29  ;;  %v2152_v25 = vld [vmem:[%s2832_s12 + $0x10] sm:$0xff]   ;;  %v2154_v26 = vld [vmem:[%s2832_s12 + $0x48] sm:$0xff]  }
 0x2c8   :  { %v1217_v45 = vadd.f32 %v1209_v30, %v1192_v37  ;;  %v1220_v5 = vmax.f32 %v1216_v36, 0.0  ;;  %v1455_v30 = vld [vmem:[#allocation10 + $0x98] sm:$0xff]  ;;  %v1452_v36 = vld [vmem:[#allocation10 + $0x80] sm:$0xff]  ;;  %v1454_v37 = vld [vmem:[#allocation10 + $0x90] sm:$0xff] }
 0x2c9   :  { %v1507_v32 = vunpack.c.h.s8.bf16 %v1455_v30  ;;  %v1504_v40 = vunpack.c.h.s8.bf16 %v1452_v36  ;;  %1562 = vmatprep.subr.bf16.mxu0 %v1505_v3  ;;  %v1503_v51 = vunpack.c.l.s8.bf16 %v1455_v30  ;;  %v1502_v42 = vunpack.c.l.s8.bf16 %v1454_v37  ;;  %v2157_v29 = vld [vmem:[%s2832_s12 + $0x88] sm:$0xff]   ;;  %v2158_v30 = vld [vmem:[%s2832_s12 + $0x40] sm:$0xff]  }
 0x2ca   :  { %v1221_v43 = vmax.f32 %v1217_v45, 0.0  ;;  %v1224_v47 = vpack.c.bf16 %v1220_v5, %v1220_v5  ;;  %v1506_v45 = vunpack.c.h.s8.bf16 %v1454_v37  ;;  %v1500_v5 = vunpack.c.l.s8.bf16 %v1452_v36  ;;  %v2160_v3 = vld [vmem:[%s2832_s12] sm:$0xff]   ;;  %v1533_v36 = vld [vmem:[#allocation12] sm:$0xf]  ;;  %v1532_v37 = vld [vmem:[#allocation13] sm:$0xf] }
 0x2cb   :  { %1563 = vmatpush2.bf16.msra.mxu0 %v1504_v40  ;;  %v1620_v40 = vrot.slane %v1533_v36, %v2489_v4 }
 0x2cc   :  { %v1225_v44 = vpack.c.bf16 %v1221_v43, %v1221_v43  ;;  %1564 = vmatprep.subr.bf16.mxu0 %v1501_v34  ;;  %v2130_v43 = vld [vmem:[%s2832_s12 + $0x78] sm:$0xff]   ;;  %v1645_v34 = vrot.slane %v1532_v37, %v2489_v4 }
 0x2ce   :  { %1397 = vmatprep.mubr.bf16.mxu1 %v1225_v44  ;;  %v2131_v44 = vld [vmem:[%s2832_s12 + $0xf8] sm:$0xff]  }
 0x2cf   :  { %1398 = vmatmul.mubr.bf16.vlgmr.msra.gmra.mxu1 %v1224_v47  ;;  %1565 = vmatpush2.bf16.msra.mxu0 %v1500_v5  ;;  %v1322_v47 = vld [vmem:[%s2828_s8] sm:$0x3]  ;;  %v1624_v5 = vrot.slane %v1533_v36, %v2500_v7 }
 0x2d0   :  { %1576 = vmatpush1.bf16.msra.mxu1 %v1498_v46  ;;  %2073 = vmatprep.subr.bf16.mxu0 %v2130_v43  ;;  %v1323_v46 = vld [vmem:[#allocation9] sm:$0x3] }
 0x2d1   :  { %1577 = vmatprep.subr.bf16.mxu1 %v1495_v48  ;;  %v1410_v48 = vrot.slane %v1323_v46, %v2489_v4  ;;  %v1414_v38 = vrot.slane %v1323_v46, %v2500_v7 }
 0x2d4   :  { %1578 = vmatpush1.bf16.msra.mxu1 %v1494_v49 }
 0x2d5   :  { %1579 = vmatprep.subr.bf16.mxu1 %v1491_v50  ;;  %v1423_v50 = vrot.slane %v1322_v47, %v2489_v4 }
 0x2d8   :  { %1580 = vmatpush1.bf16.msra.mxu1 %v1490_v52 }
 0x2d9   :  { %1581 = vmatprep.subr.bf16.mxu1 %v1487_v33 }
 0x2dc   :  { %1582 = vmatpush1.bf16.msra.mxu1 %v1486_v55  ;;  %v1427_v55 = vrot.slane %v1322_v47, %v2500_v7 }
 0x2dd   :  { %1583 = vmatprep.subr.bf16.mxu1 %v1483_v63 }
 0x2e0   :  { %1584 = vmatpush1.bf16.msra.mxu1 %v1482_v35 }
 0x2e1   :  { %1585 = vmatprep.subr.bf16.mxu1 %v1479_v57 }
 0x2e4   :  { %1586 = vmatpush1.bf16.msra.mxu1 %v1478_v58 }
 0x2e5   :  { %1587 = vmatprep.subr.bf16.mxu1 %v1475_v59 }
 0x2e8   :  { %1588 = vmatpush1.bf16.msra.mxu1 %v1474_v61  ;;  %v2132_v61 = vld [vmem:[%s2832_s12 + $0x38] sm:$0xff]  }
 0x2e9   :  { %1589 = vmatprep.subr.bf16.mxu1 %v1471_v21  ;;  %v2133_v21 = vld [vmem:[%s2832_s12 + $0xb8] sm:$0xff]  }
 0x2ec   :  { %1590 = vmatpush1.bf16.msra.mxu1 %v1470_v20  ;;  %v2134_v20 = vld [vmem:[%s2832_s12 + $0x70] sm:$0xff]  }
 0x2ed   :  { %1591 = vmatprep.subr.bf16.mxu1 %v1531_v62  ;;  %v2135_v62 = vld [vmem:[%s2832_s12 + $0xf0] sm:$0xff]  }
 0x2f0   :  { %1592 = vmatpush2.bf16.msra.mxu1 %v1530_v1  ;;  %v2137_v1 = vld [vmem:[%s2832_s12 + $0xb0] sm:$0xff]  }
 0x2f1   :  { %1593 = vmatprep.subr.bf16.mxu1 %v1527_v2  ;;  %v2138_v2 = vld [vmem:[%s2832_s12 + $0x68] sm:$0xff]  }
 0x2f4   :  { %1594 = vmatpush2.bf16.msra.mxu1 %v1526_v11  ;;  %v2140_v11 = vld [vmem:[%s2832_s12 + $0x28] sm:$0xff]  }
 0x2f5   :  { %1595 = vmatprep.subr.bf16.mxu1 %v1523_v12  ;;  %v2141_v12 = vld [vmem:[%s2832_s12 + $0xa8] sm:$0xff]  }
 0x2f8   :  { %1596 = vmatpush2.bf16.msra.mxu1 %v1522_v14  ;;  %v2143_v14 = vld [vmem:[%s2832_s12 + $0xe0] sm:$0xff]  }
 0x2f9   :  { %1597 = vmatprep.subr.bf16.mxu1 %v1519_v15  ;;  %v2144_v15 = vld [vmem:[%s2832_s12 + $0x20] sm:$0xff]  }
 0x2fc   :  { %1598 = vmatpush2.bf16.msra.mxu1 %v1518_v16  ;;  %v2146_v16 = vld [vmem:[%s2832_s12 + $0x58] sm:$0xff]  }
 0x2fd   :  { %1599 = vmatprep.subr.bf16.mxu1 %v1515_v17  ;;  %v2147_v17 = vld [vmem:[%s2832_s12 + $0xd8] sm:$0xff]  }
 0x300   :  { %1600 = vmatpush2.bf16.msra.mxu1 %v1514_v19  ;;  %v2149_v19 = vld [vmem:[%s2832_s12 + $0x98] sm:$0xff]  }
 0x301   :  { %1601 = vmatprep.subr.bf16.mxu1 %v1511_v53  ;;  %v2153_v53 = vld [vmem:[%s2832_s12 + $0x90] sm:$0xff]  }
 0x304   :  { %1602 = vmatpush2.bf16.msra.mxu1 %v1510_v27  ;;  %v2155_v27 = vld [vmem:[%s2832_s12 + $0xc8] sm:$0xff]  }
 0x305   :  { %1603 = vmatprep.subr.bf16.mxu1 %v1507_v32  ;;  %v2161_v32 = vld [vmem:[%s2832_s12 + $0x80] sm:$0xff]  }
 0x308   :  { %1604 = vmatpush2.bf16.msra.mxu1 %v1506_v45  ;;  %v1628_v45 = vrot.slane %v1533_v36, %v2497_v6 }
 0x309   :  { %1605 = vmatprep.subr.bf16.mxu1 %v1503_v51  ;;  %v1653_v51 = vrot.slane %v1532_v37, %v2497_v6 }
 0x30c   :  { %1606 = vmatpush2.bf16.msra.mxu1 %v1502_v42  ;;  %v1632_v42 = vrot.slane %v1533_v36, %v2503_v8 }
 0x30d   :  { %2095 = vmatprep.subr.bf16.mxu1 %v2131_v44 }
 0x30f   :  { %v1358_v22 = vpop.f32.mrf.mxu0 }
 0x311   :  { %v1360_v23 = vpop.f32.mrf.mxu0 }
 0x313   :  { %v1362_v28 = vpop.f32.mrf.mxu0 }
 0x314   :  { %v2156_v28 = vld [vmem:[%s2832_s12 + $0x8] sm:$0xff]  }
 0x315   :  { %v1363_v31 = vpop.f32.mrf.mxu0 }
 0x316   :  { %v2159_v31 = vld [vmem:[%s2832_s12 + $0xc0] sm:$0xff]  }
 0x38f   :  { %v1399_v41 = vpop.f32.mrf.mxu1 }
 0x390   :  { %v1400_v49 = vadd.f32 %v1399_v41, %v1358_v22  ;;  %v2150_v22 = vld [vmem:[%s2832_s12 + $0x50] sm:$0xff]   ;;  %v1657_v41 = vrot.slane %v1532_v37, %v2503_v8 }
 0x391   :  { %v1401_v52 = vpop.f32.mrf.mxu1 }
 0x392   :  { %v1417_v33 = vmul.f32 %v1410_v48, %v1400_v49  ;;  %v1402_v54 = vadd.f32 %v1401_v52, %v1360_v23  ;;  %v2151_v23 = vld [vmem:[%s2832_s12 + $0xd0] sm:$0xff]   ;;  %v1649_v48 = vrot.slane %v1532_v37, %v2500_v7 }
 0x393   :  { %v1403_v63 = vpop.f32.mrf.mxu1 }
 0x394   :  { %v1430_v56 = vadd.f32 %v1423_v50, %v1417_v33  ;;  %v1418_v35 = vmul.f32 %v1414_v38, %v1402_v54 }
 0x395   :  { %v1404_v57 = vpop.f32.mrf.mxu1 }
 0x396   :  { %v1431_v9 = vadd.f32 %v1427_v55, %v1418_v35  ;;  %v1432_v58 = vmax.f32 %v1430_v56, 0.0 }
 0x398   :  { %v1433_v59 = vmax.f32 %v1431_v9, 0.0  ;;  %v1434_v24 = vpack.c.bf16 %v1432_v58, %v1432_v58 }
 0x39a   :  { %v1435_v60 = vpack.c.bf16 %v1433_v59, %v1433_v59 }
 0x39c   :  { %1566 = vmatprep.mubr.bf16.mxu0 %v1435_v60  ;;  %1607 = vmatprep.mubr.bf16.mxu1 %v1435_v60 }
 0x39d   :  { %1567 = vmatmul.mubr.bf16.vlgmr.msra.gmra.mxu0 %v1434_v24  ;;  %1608 = vmatmul.mubr.bf16.vlgmr.msra.gmra.mxu1 %v1434_v24 }
 0x39e   :  { %2074 = vmatpush3.bf16.msra.mxu0 %v2132_v61  ;;  %2096 = vmatpush3.bf16.msra.mxu1 %v2133_v21 }
 0x39f   :  { %2075 = vmatprep.subr.bf16.mxu0 %v2134_v20  ;;  %2097 = vmatprep.subr.bf16.mxu1 %v2135_v62  ;;  %v2040_v20 = vld [vmem:[#allocation15] ss:$0 sm:$0xff] }
 0x3a2   :  { %2076 = vmatpush3.bf16.msra.mxu0 %v2136_v0  ;;  %2098 = vmatpush3.bf16.msra.mxu1 %v2137_v1 }
 0x3a3   :  { %2077 = vmatprep.subr.bf16.mxu0 %v2138_v2  ;;  %2099 = vmatprep.subr.bf16.mxu1 %v2139_v10 }
 0x3a6   :  { %2078 = vmatpush3.bf16.msra.mxu0 %v2140_v11  ;;  %2100 = vmatpush3.bf16.msra.mxu1 %v2141_v12 }
 0x3a7   :  { %2079 = vmatprep.subr.bf16.mxu0 %v2142_v13  ;;  %2101 = vmatprep.subr.bf16.mxu1 %v2143_v14 }
 0x3aa   :  { %2080 = vmatpush3.bf16.msra.mxu0 %v2144_v15  ;;  %2102 = vmatpush3.bf16.msra.mxu1 %v2145_v39 }
 0x3ab   :  { %2081 = vmatprep.subr.bf16.mxu0 %v2146_v16  ;;  %2103 = vmatprep.subr.bf16.mxu1 %v2147_v17 }
 0x3ae   :  { %2082 = vmatpush3.bf16.msra.mxu0 %v2148_v18  ;;  %2104 = vmatpush3.bf16.msra.mxu1 %v2149_v19 }
 0x3af   :  { %2083 = vmatprep.subr.bf16.mxu0 %v2150_v22  ;;  %2105 = vmatprep.subr.bf16.mxu1 %v2151_v23 }
 0x3b2   :  { %2084 = vmatpush3.bf16.msra.mxu0 %v2152_v25  ;;  %2106 = vmatpush3.bf16.msra.mxu1 %v2153_v53 }
 0x3b3   :  { %2085 = vmatprep.subr.bf16.mxu0 %v2154_v26  ;;  %2107 = vmatprep.subr.bf16.mxu1 %v2155_v27 }
 0x3b6   :  { %2086 = vmatpush3.bf16.msra.mxu0 %v2156_v28  ;;  %2108 = vmatpush3.bf16.msra.mxu1 %v2157_v29 }
 0x3b7   :  { %2087 = vmatprep.subr.bf16.mxu0 %v2158_v30  ;;  %2109 = vmatprep.subr.bf16.mxu1 %v2159_v31 }
 0x3ba   :  { %2088 = vmatpush3.bf16.msra.mxu0 %v2160_v3  ;;  %2110 = vmatpush3.bf16.msra.mxu1 %v2161_v32 }
 0x45d   :  { %v1568_v43 = vpop.f32.mrf.mxu0  ;;  %v1609_v44 = vpop.f32.mrf.mxu1 }
 0x45e   :  { %v1637_v46 = vmul.f32 %v1620_v40, %v1568_v43  ;;  %v1639_v47 = vmul.f32 %v1628_v45, %v1609_v44 }
 0x45f   :  { %v1570_v49 = vpop.f32.mrf.mxu0  ;;  %v1611_v50 = vpop.f32.mrf.mxu1 }
 0x460   :  { %v1662_v38 = vadd.f32 %v1645_v34, %v1637_v46  ;;  %v1664_v52 = vadd.f32 %v1653_v51, %v1639_v47  ;;  %v1638_v33 = vmul.f32 %v1624_v5, %v1570_v49  ;;  %v1640_v4 = vmul.f32 %v1632_v42, %v1611_v50 }
 0x461   :  { %v1572_v54 = vpop.f32.mrf.mxu0  ;;  %v1613_v6 = vpop.f32.mrf.mxu1 }
 0x462   :  { %v1663_v55 = vadd.f32 %v1649_v48, %v1638_v33  ;;  %v1665_v63 = vadd.f32 %v1657_v41, %v1640_v4  ;;  %v1666_v56 = vmax.f32 %v1662_v38, 0.0  ;;  %v1668_v35 = vmax.f32 %v1664_v52, 0.0 }
 0x463   :  { %v1573_v57 = vpop.f32.mrf.mxu0  ;;  %v1614_v9 = vpop.f32.mrf.mxu1 }
 0x464   :  { %v1667_v58 = vmax.f32 %v1663_v55, 0.0  ;;  %v1669_v59 = vmax.f32 %v1665_v63, 0.0  ;;  %v1670_v61 = vpack.c.bf16 %v1666_v56, %v1666_v56  ;;  %v1672_v8 = vpack.c.bf16 %v1668_v35, %v1668_v35 }
 0x466   :  { %v1671_v60 = vpack.c.bf16 %v1667_v58, %v1667_v58  ;;  %v1673_v7 = vpack.c.bf16 %v1669_v59, %v1669_v59 }
 0x468   :  { %1969 = vmatprep.mubr.bf16.mxu0 %v1671_v60  ;;  %2009 = vmatprep.mubr.bf16.mxu1 %v1673_v7 }
 0x469   :  { %1970 = vmatmul.mubr.bf16.vlgmr.msra.gmra.mxu0 %v1670_v61  ;;  %2010 = vmatmul.mubr.bf16.vlgmr.msra.gmra.mxu1 %v1672_v8 }
 0x529   :  { %v2089_v21 = vpop.f32.mrf.mxu0  ;;  %v2111_v24 = vpop.f32.mrf.mxu1 }
 0x52b   :  { %v2090_v62 = vpop.f32.mrf.mxu0  ;;  %v2112_v0 = vpop.f32.mrf.mxu1 }
 0x52c   :  { %v2091_v1 = vadd.f32 %v2090_v62, %v2089_v21  ;;  %v2113_v12 = vadd.f32 %v2112_v0, %v2111_v24 }
 0x52d   :  { %v2092_v2 = vpop.f32.mrf.mxu0  ;;  %v2114_v10 = vpop.f32.mrf.mxu1 }
 0x52e   :  { %v1972_v11 = vadd.f32 %v2091_v1, %v2040_v20 }
 0x52f   :  { %v2093_v13 = vpop.f32.mrf.mxu0  ;;  %v2115_v14 = vpop.f32.mrf.mxu1 }
 0x530   :  { %v2012_v15 = vadd.f32 %v2113_v12, %v1972_v11 }
 0x532   :  { %2018 = vst.msk [vmem:[%s2834_s14] sm:$0xff] %vm2017_vm3, %v2012_v15 }
 0x533   :  { %2023 = vsyncpa [#allocation3], 1 }
 0x534   :  { %2024 = vsyncpa [#allocation5], 1 }
 0x535   :  { %2025 = vsyncpa [#allocation8], 1 }
 0x536   :  { %2026 = vsyncpa [#allocation11], 1 }
 0x537   :  { %2027 = vsyncpa [#allocation14], 1 }

</bundles_post_ra>
